<compile_context>
chip_gen: v7x
topology: tpu7x:2x2x1
jax: 0.10.0
libtpu: 0.0.40
codegen_flags: <defaults>
</compile_context>

<pallas_src>
import functools

import jax
import jax.numpy as jnp
from jax.experimental import pallas as pl
from jax.experimental.pallas import tpu as pltpu

NUM_ATOM_TYPE = 120
NUM_CHIRALITY = 3
NUM_BOND_TYPE = 6
NUM_BOND_DIR = 3
BN_EPS = 1e-5

LANE = 128
MAX_TILE = 512                       # row / reduction tile (multiple of 128)
VMEM_LIMIT = 48 * 1024 * 1024        # under v7x's 64 MiB physical VMEM (v5e/v6e: 128 MiB)


def _round_up(x, m):
    return ((x + m - 1) // m) * m


def _pad2(x, rows, cols):
    return jnp.pad(x, ((0, rows - x.shape[0]), (0, cols - x.shape[1])))


# --------------------------- fused Pallas kernel ------------------------------

def _fused_gin_kernel(tcol_ref, tcnt_ref,                 # scalar prefetch (SMEM)
                      h0_ref,                             # raw HBM ref (pl.ANY)
                      a_ref, eagg_ref, w1_ref, b1_ref, w2_ref, b2_ref,
                      p_ref, pw_ref, pb_ref,
                      hout_ref, pred_ref,
                      acc_ref, h_scr, pool_scr,
                      *, num_layers, tile):
    l = pl.program_id(0)          # GIN layer (sequential dependency via h)
    i = pl.program_id(1)          # destination-row tile
    k = pl.program_id(2)          # index into this row tile's nonzero source tiles
    ni = pl.num_programs(1)
    nk = pl.num_programs(2)
    last_layer = num_layers - 1

    # one-time prologue: zero the pooled-feature accumulator and DMA the initial node
    # embeddings straight into the layer-0 read slot of the resident h ping-pong.
    # (h0 is never re-streamed per layer; the old per-step jnp.where select is gone.)
    @pl.when((l == 0) & (i == 0) & (k == 0))
    def _():
        pool_scr[...] = jnp.zeros_like(pool_scr)
        pltpu.sync_copy(h0_ref, h_scr.at[1])

    # seed the aggregation accumulator with this layer's per-node edge aggregation
    @pl.when(k == 0)
    def _():
        acc_ref[...] = eagg_ref[...].astype(jnp.float32)

    # block-sparse GIN "add" aggregation: acc[i-tile] += A[i-tile, col-tile] @ h_prev.
    # Steps past tcnt[i] repeat the previous block index (no DMA) and skip the dot.
    read_buf = (l + 1) & 1
    @pl.when(k < tcnt_ref[i])
    def _():
        col = tcol_ref[i, k]
        row0 = pl.multiple_of(col * tile, tile)
        h_prev = h_scr[read_buf, pl.ds(row0, tile), :]
        a_blk = a_ref[...].astype(jnp.float32).astype(jnp.bfloat16)   # int8 counts -> bf16
        acc_ref[...] += jnp.dot(a_blk, h_prev, preferred_element_type=jnp.float32)

    # epilogue: MLP + (folded) BatchNorm (+ ReLU), once per (layer, row tile)
    @pl.when(k == nk - 1)
    def _():
        aggr = acc_ref[...]
        z1 = jnp.dot(aggr.astype(jnp.bfloat16), w1_ref[...],
                     preferred_element_type=jnp.float32) + b1_ref[...]
        z1 = jnp.maximum(z1, 0.0)
        # eval-mode BatchNorm1d is folded into w2/b2 at trace time
        h_new = jnp.dot(z1.astype(jnp.bfloat16), w2_ref[...],
                        preferred_element_type=jnp.float32) + b2_ref[...]
        # jk='last': ReLU after every layer except the final one; dropout_prob=0 -> identity
        h_new = jnp.where(l == last_layer, h_new, jnp.maximum(h_new, 0.0))

        # stash for the next layer (bf16 halves the resident VMEM footprint)
        i_row = pl.multiple_of(i * tile, tile)
        h_scr[l & 1, pl.ds(i_row, tile), :] = h_new.astype(jnp.bfloat16)

        # only the final layer's node embeddings / pooled features touch HBM
        @pl.when(l == last_layer)
        def _():
            hout_ref[...] = h_new
            pool_scr[...] += jnp.dot(p_ref[...], h_new,
                                     preferred_element_type=jnp.float32)

        # prediction head once everything is pooled (lane-padded output, full vst)
        @pl.when((l == last_layer) & (i == ni - 1))
        def _():
            pred_ref[...] = jnp.dot(pool_scr[...], pw_ref[...],
                                    preferred_element_type=jnp.float32) + pb_ref[...]


def fused_gnn_forward(tile_cols, tile_cnt, h0, a, eagg, w1, b1, w2, b2, p, pw, pb,
                      num_layers, tile):
    n_pad, dp = h0.shape
    hp = w1.shape[2]
    gp = p.shape[0]
    pred_p = pw.shape[1]
    ni = n_pad // tile
    max_nk = tile_cols.shape[1]
    last = num_layers - 1

    # rough VMEM budget: resident scratch + double-buffered streamed blocks
    resident = 2 * n_pad * dp * 2 + tile * dp * 4 + gp * dp * 4
    streamed = 2 * (tile * tile * 1 + tile * dp * 2 + dp * hp * 2 + hp * 4
                    + hp * dp * 2 + dp * 4 + gp * tile * 4 + dp * pred_p * 4
                    + pred_p * 4 + tile * dp * 4 + gp * pred_p * 4)
    if resident + streamed > VMEM_LIMIT:
        # TODO(synk): fall back to streaming h_prev from HBM (single resident buffer) for
        # graphs whose resident h ping-pong exceeds the v7x 64 MiB VMEM budget.
        raise ValueError("graph too large for the resident-h VMEM budget")

    kernel = functools.partial(_fused_gin_kernel, num_layers=num_layers, tile=tile)

    hout, pred = pl.pallas_call(
        kernel,
        out_shape=(jax.ShapeDtypeStruct((n_pad, dp), jnp.float32),
                   jax.ShapeDtypeStruct((gp, pred_p), jnp.float32)),
        grid_spec=pltpu.PrefetchScalarGridSpec(
            num_scalar_prefetch=2,
            grid=(num_layers, ni, max_nk),
            in_specs=[
                pl.BlockSpec(memory_space=pl.ANY),                                  # h0 (HBM, copied once)
                pl.BlockSpec((tile, tile),
                             lambda l, i, k, tc, cc: (i, tc[i, k])),                # A (int8, block-sparse)
                pl.BlockSpec((None, tile, dp), lambda l, i, k, tc, cc: (l, i, 0)),  # per-layer edge agg
                pl.BlockSpec((None, dp, hp), lambda l, i, k, tc, cc: (l, 0, 0)),    # w1 (resident per layer)
                pl.BlockSpec((None, 1, hp), lambda l, i, k, tc, cc: (l, 0, 0)),     # b1
                pl.BlockSpec((None, hp, dp), lambda l, i, k, tc, cc: (l, 0, 0)),    # w2 (BN folded)
                pl.BlockSpec((None, 1, dp), lambda l, i, k, tc, cc: (l, 0, 0)),     # b2 (BN folded)
                pl.BlockSpec((gp, tile),
                             lambda l, i, k, tc, cc: (0, jnp.where(l == last, i, 0))),  # pool matrix P
                pl.BlockSpec((dp, pred_p), lambda l, i, k, tc, cc: (0, 0)),         # pred weight (padded)
                pl.BlockSpec((1, pred_p), lambda l, i, k, tc, cc: (0, 0)),          # pred bias (padded)
            ],
            out_specs=[
                # block index only walks i on the last layer -> node embeddings are written
                # back to HBM exactly once (no per-layer redundant writebacks)
                pl.BlockSpec((tile, dp),
                             lambda l, i, k, tc, cc: (jnp.where(l == last, i, 0), 0)),
                pl.BlockSpec((gp, pred_p), lambda l, i, k, tc, cc: (0, 0)),
            ],
            scratch_shapes=[
                pltpu.VMEM((tile, dp), jnp.float32),       # aggregation accumulator
                pltpu.VMEM((2, n_pad, dp), jnp.bfloat16),  # h ping-pong, resident across layers
                pltpu.VMEM((gp, dp), jnp.float32),         # pooled-feature accumulator
            ]),
        compiler_params=pltpu.CompilerParams(
            # layer & k are sequential; the row axis shares h_scr/pool_scr, so it cannot be
            # megacore-sharded as-is.
            # TODO(synk): v7x two-TC split of the row axis (per-core acc/pool partials,
            # VMEM_SHARED h, core_barrier per layer).
            dimension_semantics=("arbitrary", "arbitrary", "arbitrary"),
            vmem_limit_bytes=VMEM_LIMIT),
    )(tile_cols, tile_cnt, h0, a, eagg, w1, b1, w2, b2, p, pw, pb)
    return hout, pred


# ------------------------------ parameters -----------------------------------

def init_params(key, num_layer, emb_dim):
    if num_layer < 2:
        raise ValueError('Number of layers must be > 2.')
    d = emb_dim
    n_keys = 2 + 6 * num_layer + 2
    keys = iter(jax.random.split(key, n_keys))

    def rnd(shape, scale=0.1):
        return (scale * jax.random.normal(next(keys), shape)).astype(jnp.float32)

    params = {
        'x_emb1': rnd((NUM_ATOM_TYPE, d)),
        'x_emb2': rnd((NUM_CHIRALITY, d)),
        'layers': [],
        'pred_w': rnd((d, 1)),           # graph_pred_linear weight (stored transposed)
        'pred_b': rnd((1, 1)),
    }
    for _ in range(num_layer):
        params['layers'].append({
            'edge_emb1': rnd((NUM_BOND_TYPE, d)),
            'edge_emb2': rnd((NUM_BOND_DIR, d)),
            'w1': rnd((d, 2 * d)),
            'b1': rnd((1, 2 * d)),
            'w2': rnd((2 * d, d)),
            'b2': rnd((1, d)),
            'bn_gamma': jnp.ones((1, d), jnp.float32),
            'bn_beta': jnp.zeros((1, d), jnp.float32),
            'bn_mean': jnp.zeros((1, d), jnp.float32),
            'bn_var': jnp.ones((1, d), jnp.float32),
        })
    return params


# ------------------------------ forward glue ----------------------------------

def _with_self_loops(n, edge_index, edge_attr):
    self_loops = jnp.stack([jnp.arange(n), jnp.arange(n)], axis=0).astype(edge_index.dtype)
    ei = jnp.concatenate([edge_index, self_loops], axis=1)
    sl_attr = jnp.concatenate(
        [jnp.full((n, 1), 4, edge_attr.dtype), jnp.zeros((n, 1), edge_attr.dtype)], axis=1)
    ea = jnp.concatenate([edge_attr, sl_attr], axis=0)
    return ei, ea


def gnn_prediction_forward(params, x, edge_index, edge_attr, batch, num_graphs):
    n = x.shape[0]
    d = params['x_emb1'].shape[1]
    num_layer = len(params['layers'])

    dp = _round_up(d, LANE)                       # lane-padded feature width
    hp = _round_up(2 * d, LANE)                   # lane-padded MLP hidden width
    tile = min(MAX_TILE, _round_up(n, LANE))      # large tiles; small graphs stay small
    n_pad = _round_up(n, tile)
    ni = n_pad // tile
    g_pad = _round_up(max(num_graphs, 8), 8)
    pred_p = LANE                                 # lane-padded prediction width

    # self-loops (edge_attr = [4, 0]) as in GINConv.forward
    ei, ea = _with_self_loops(n, edge_index, edge_attr)
    src, dst = ei[0], ei[1]

    # dense adjacency A[i, j] = #edges j->i, stored int8 (counts are tiny; halves DMA bytes)
    a = jnp.zeros((n, n), jnp.float32).at[dst, src].add(1.0)
    a = _pad2(a, n_pad, n_pad).astype(jnp.int8)

    # block-sparsity metadata: per row tile, the sorted nonzero column tiles; padding
    # repeats the last valid entry so padded grid steps reuse the previous block (no DMA).
    nz = jnp.zeros((ni, ni), jnp.bool_).at[dst // tile, src // tile].set(True)
    tile_cnt = nz.sum(axis=1).astype(jnp.int32)                 # >= 1 thanks to self-loops
    order = jnp.argsort(~nz, axis=1, stable=True).astype(jnp.int32)
    # NOTE: max_nk is computed on the host (this wrapper is eager); under jit use a static
    # upper bound (ni).
    max_nk = max(int(jnp.max(tile_cnt)), 1)
    kk = jnp.arange(max_nk, dtype=jnp.int32)[None, :]
    idx = jnp.clip(jnp.minimum(kk, tile_cnt[:, None] - 1), 0, ni - 1)
    tile_cols = jnp.take_along_axis(order, idx, axis=1)

    # initial node embeddings (embedding lookups = glue)
    h0 = params['x_emb1'][x[:, 0]] + params['x_emb2'][x[:, 1]]
    h0 = _pad2(h0.astype(jnp.float32), n_pad, dp).astype(jnp.bfloat16)

    # per-layer edge aggregation + BN-folded MLP params, stacked along a layer axis
    eaggs, w1s, b1s, w2s, b2s = [], [], [], [], []
    for lp in params['layers']:
        edge_emb = lp['edge_emb1'][ea[:, 0]] + lp['edge_emb2'][ea[:, 1]]
        eagg = jnp.zeros((n, d), jnp.float32).at[dst].add(edge_emb)
        eaggs.append(_pad2(eagg, n_pad, dp).astype(jnp.bfloat16))

        # fold eval-mode BatchNorm1d into the second Linear:
        #   y = gamma * (z2 - mean) * rsqrt(var + eps) + beta
        scale = lp['bn_gamma'] * jax.lax.rsqrt(lp['bn_var'] + BN_EPS)     # (1, d)
        w2f = lp['w2'] * scale                                            # (2d, d)
        b2f = (lp['b2'] - lp['bn_mean']) * scale + lp['bn_beta']          # (1, d)

        w1s.append(_pad2(lp['w1'], dp, hp).astype(jnp.bfloat16))
        b1s.append(_pad2(lp['b1'], 1, hp).astype(jnp.float32))
        w2s.append(_pad2(w2f, hp, dp).astype(jnp.bfloat16))
        b2s.append(_pad2(b2f, 1, dp).astype(jnp.float32))

    eagg_s = jnp.stack(eaggs)          # (L, n_pad, dp)
    w1_s = jnp.stack(w1s)              # (L, dp, hp)
    b1_s = jnp.stack(b1s)              # (L, 1, hp)
    w2_s = jnp.stack(w2s)              # (L, hp, dp)
    b2_s = jnp.stack(b2s)              # (L, 1, dp)

    # global mean pool membership matrix P (G, N), zero-padded
    onehot = (batch[None, :] == jnp.arange(num_graphs)[:, None]).astype(jnp.float32)
    counts = jnp.maximum(onehot.sum(axis=1, keepdims=True), 1.0)
    p = _pad2(onehot / counts, g_pad, n_pad)

    # prediction head, lane padded (real weights live in column 0)
    pw = _pad2(params['pred_w'], dp, pred_p)
    pb = _pad2(params['pred_b'], 1, pred_p)

    h_out, pred = fused_gnn_forward(tile_cols, tile_cnt, h0, a, eagg_s,
                                    w1_s, b1_s, w2_s, b2_s, p, pw, pb, num_layer, tile)
    return pred[:num_graphs, :1], h_out[:n, :d]


# ----------------------------- pure-JAX reference ------------------------------

def reference_forward(params, x, edge_index, edge_attr, batch, num_graphs):
    n = x.shape[0]
    ei, ea = _with_self_loops(n, edge_index, edge_attr)
    src, dst = ei[0], ei[1]
    h = params['x_emb1'][x[:, 0]] + params['x_emb2'][x[:, 1]]
    num_layer = len(params['layers'])
    for li, lp in enumerate(params['layers']):
        edge_emb = lp['edge_emb1'][ea[:, 0]] + lp['edge_emb2'][ea[:, 1]]
        aggr = jnp.zeros_like(h).at[dst].add(h[src] + edge_emb)
        z = jnp.maximum(aggr @ lp['w1'] + lp['b1'], 0.0) @ lp['w2'] + lp['b2']
        z = (z - lp['bn_mean']) * lp['bn_gamma'] * jax.lax.rsqrt(lp['bn_var'] + BN_EPS) \
            + lp['bn_beta']
        h = z if li == num_layer - 1 else jnp.maximum(z, 0.0)
    onehot = (batch[None, :] == jnp.arange(num_graphs)[:, None]).astype(jnp.float32)
    pooled = (onehot @ h) / jnp.maximum(onehot.sum(axis=1, keepdims=True), 1.0)
    pred = pooled @ params['pred_w'] + params['pred_b']
    return pred, h


# ---------------------------------- main ---------------------------------------

if __name__ == "__main__":
    key = jax.random.PRNGKey(0)
    k_par, k_x1, k_x2, k_src, k_dst, k_ea1, k_ea2 = jax.random.split(key, 7)

    num_layer = 3
    emb_dim = 32
    num_nodes = 24       # 12 nodes per graph
    num_graphs = 2
    num_edges = 40       # 20 edges per graph

    params = init_params(k_par, num_layer, emb_dim)

    # node features: [atom_type, chirality_tag]
    x = jnp.stack([
        jax.random.randint(k_x1, (num_nodes,), 0, NUM_ATOM_TYPE),
        jax.random.randint(k_x2, (num_nodes,), 0, NUM_CHIRALITY),
    ], axis=1).astype(jnp.int32)

    # edges kept within each graph (first 20 in graph 0, last 20 in graph 1)
    half_n = num_nodes // 2
    half_e = num_edges // 2
    src0 = jax.random.randint(k_src, (half_e,), 0, half_n)
    dst0 = jax.random.randint(k_dst, (half_e,), 0, half_n)
    src1 = jax.random.randint(k_src, (half_e,), 0, half_n) + half_n
    dst1 = jax.random.randint(k_dst, (half_e,), 0, half_n) + half_n
    edge_index = jnp.stack([jnp.concatenate([src0, src1]),
                            jnp.concatenate([dst0, dst1])], axis=0).astype(jnp.int32)

    # edge features: [bond_type, bond_direction]
    edge_attr = jnp.stack([
        jax.random.randint(k_ea1, (num_edges,), 0, NUM_BOND_TYPE),
        jax.random.randint(k_ea2, (num_edges,), 0, NUM_BOND_DIR),
    ], axis=1).astype(jnp.int32)

    batch = jnp.concatenate([jnp.zeros((half_n,), jnp.int32),
                             jnp.ones((half_n,), jnp.int32)])

    pred, node_embeddings = gnn_prediction_forward(params, x, edge_index, edge_attr,
                                                   batch, num_graphs)
    jax.block_until_ready((pred, node_embeddings))

    assert pred.shape == (num_graphs, 1)
    assert node_embeddings.shape == (num_nodes, emb_dim)
    assert bool(jnp.all(jnp.isfinite(pred))) and bool(jnp.all(jnp.isfinite(node_embeddings)))

    # correctness vs. pure-JAX f32 reference (bf16-matmul tolerance)
    pred_ref, h_ref = reference_forward(params, x, edge_index, edge_attr, batch, num_graphs)
    assert bool(jnp.allclose(pred, pred_ref, atol=5e-2, rtol=5e-2))
    assert bool(jnp.allclose(node_embeddings, h_ref, atol=5e-2, rtol=5e-2))

    print("KERNEL_OK")
</pallas_src>

<mosaic_0001>
module attributes {stable_mosaic.version = 11 : i64} {
  func.func @_fused_gin_kernel(%arg0: i32, %arg1: i32, %arg2: i32, %arg3: memref<1x1xi32, #tpu.memory_space<smem>>, %arg4: memref<1xi32, #tpu.memory_space<smem>>, %arg5: memref<128x128xbf16, #tpu.memory_space<any>>, %arg6: memref<128x128xi8, #tpu.memory_space<vmem>>, %arg7: memref<1x128x128xbf16, #tpu.memory_space<vmem>>, %arg8: memref<1x128x128xbf16, #tpu.memory_space<vmem>>, %arg9: memref<1x1x128xf32, #tpu.memory_space<vmem>>, %arg10: memref<1x128x128xbf16, #tpu.memory_space<vmem>>, %arg11: memref<1x1x128xf32, #tpu.memory_space<vmem>>, %arg12: memref<8x128xf32, #tpu.memory_space<vmem>>, %arg13: memref<128x128xf32, #tpu.memory_space<vmem>>, %arg14: memref<1x128xf32, #tpu.memory_space<vmem>>, %arg15: memref<128x128xf32, #tpu.memory_space<vmem>>, %arg16: memref<8x128xf32, #tpu.memory_space<vmem>>, %arg17: memref<128x128xf32, #tpu.memory_space<vmem>>, %arg18: memref<2x128x128xbf16, #tpu.memory_space<vmem>>, %arg19: memref<8x128xf32, #tpu.memory_space<vmem>>) attributes {dimension_semantics = [#tpu.dimension_semantics<arbitrary>, #tpu.dimension_semantics<arbitrary>, #tpu.dimension_semantics<arbitrary>], iteration_bounds = array<i64: 3, 1, 1>, scalar_prefetch = 2 : i64, scratch_operands = 3 : i64, tpu.core_type = #tpu.core_type<tc>, window_params = [{}, {transform_indices = @transform_1, window_bounds = array<i64: 128, 128>}, {transform_indices = @transform_2, window_bounds = array<i64: 1, 128, 128>}, {transform_indices = @transform_3, window_bounds = array<i64: 1, 128, 128>}, {transform_indices = @transform_4, window_bounds = array<i64: 1, 1, 128>}, {transform_indices = @transform_5, window_bounds = array<i64: 1, 128, 128>}, {transform_indices = @transform_6, window_bounds = array<i64: 1, 1, 128>}, {transform_indices = @transform_7, window_bounds = array<i64: 8, 128>}, {pipeline_mode = #tpu.pipeline_mode<synchronous>, transform_indices = @transform_8, window_bounds = array<i64: 128, 128>}, {pipeline_mode = #tpu.pipeline_mode<synchronous>, transform_indices = @transform_9, window_bounds = array<i64: 1, 128>}, {transform_indices = @transform_10, window_bounds = array<i64: 128, 128>}, {pipeline_mode = #tpu.pipeline_mode<synchronous>, transform_indices = @transform_11, window_bounds = array<i64: 8, 128>}]} {
    %c0_i32 = arith.constant 0 : i32
    %0 = arith.cmpi eq, %arg0, %c0_i32 : i32
    %c0_i32_0 = arith.constant 0 : i32
    %1 = arith.cmpi eq, %arg1, %c0_i32_0 : i32
    %2 = arith.andi %0, %1 : i1
    %c0_i32_1 = arith.constant 0 : i32
    %3 = arith.cmpi eq, %arg2, %c0_i32_1 : i32
    %4 = arith.andi %2, %3 : i1
    %5 = arith.extui %4 : i1 to i32
    %c0_i32_2 = arith.constant 0 : i32
    %6 = arith.cmpi ne, %5, %c0_i32_2 : i32
    scf.if %6 {
      %cst = arith.constant 0.000000e+00 : f32
      %20 = vector.broadcast %cst : f32 to vector<8x128xf32>
      %c0 = arith.constant 0 : index
      %c0_9 = arith.constant 0 : index
      %21 = vector.load %arg19[%c0, %c0_9] : memref<8x128xf32, #tpu.memory_space<vmem>>, vector<8x128xf32>
      tpu.vector_store %arg19[%c0, %c0_9], %20 {strides = array<i32>} : memref<8x128xf32, #tpu.memory_space<vmem>>, vector<8x128xf32>,
      %c1_i32_10 = arith.constant 1 : i32
      "tpu.region"() ({
        %22 = tpu.sem_alloc : memref<!tpu.dma_semaphore, #tpu.memory_space<semaphore_mem>>
        %c0_i32_11 = arith.constant 0 : i32
        %c0_i32_12 = arith.constant 0 : i32
        %23 = tpu.memref_slice %arg18[%c1_i32_10, %c0_i32_11, %c0_i32_12] : memref<2x128x128xbf16, #tpu.memory_space<vmem>> -> memref<1x128x128xbf16, #tpu.memory_space<vmem>>
        %24 = tpu.memref_squeeze %23 : memref<1x128x128xbf16, #tpu.memory_space<vmem>> -> memref<128x128xbf16, #tpu.memory_space<vmem>>
        tpu.enqueue_dma source(%arg5 : memref<128x128xbf16, #tpu.memory_space<any>>) target(%24 : memref<128x128xbf16, #tpu.memory_space<vmem>>) target_semaphore(%22 : memref<!tpu.dma_semaphore, #tpu.memory_space<semaphore_mem>>)
        %c0_i32_13 = arith.constant 0 : i32
        %c0_i32_14 = arith.constant 0 : i32
        %25 = tpu.memref_slice %arg18[%c1_i32_10, %c0_i32_13, %c0_i32_14] : memref<2x128x128xbf16, #tpu.memory_space<vmem>> -> memref<1x128x128xbf16, #tpu.memory_space<vmem>>
        %26 = tpu.memref_squeeze %25 : memref<1x128x128xbf16, #tpu.memory_space<vmem>> -> memref<128x128xbf16, #tpu.memory_space<vmem>>
        tpu.wait_dma2 semaphore(%22 : memref<!tpu.dma_semaphore, #tpu.memory_space<semaphore_mem>>) src(%arg5 : memref<128x128xbf16, #tpu.memory_space<any>>) dst(%26 : memref<128x128xbf16, #tpu.memory_space<vmem>>)
        tpu.yield
      }) : () -> ()
    } else {
    }
    %c0_i32_3 = arith.constant 0 : i32
    %7 = arith.cmpi eq, %arg2, %c0_i32_3 : i32
    %8 = arith.extui %7 : i1 to i32
    %c0_i32_4 = arith.constant 0 : i32
    %9 = arith.cmpi ne, %8, %c0_i32_4 : i32
    scf.if %9 {
      %c0 = arith.constant 0 : index
      %c0_9 = arith.constant 0 : index
      %c0_10 = arith.constant 0 : index
      %20 = vector.load %arg7[%c0, %c0_9, %c0_10] : memref<1x128x128xbf16, #tpu.memory_space<vmem>>, vector<1x128x128xbf16>
      %21 = vector.shape_cast %20 : vector<1x128x128xbf16> to vector<128x128xbf16>
      %22 = arith.extf %21 : vector<128x128xbf16> to vector<128x128xf32>
      %c0_11 = arith.constant 0 : index
      %c0_12 = arith.constant 0 : index
      %23 = vector.load %arg17[%c0_11, %c0_12] : memref<128x128xf32, #tpu.memory_space<vmem>>, vector<128x128xf32>
      tpu.vector_store %arg17[%c0_11, %c0_12], %22 {strides = array<i32>} : memref<128x128xf32, #tpu.memory_space<vmem>>, vector<128x128xf32>,
    } else {
    }
    %c1_i32 = arith.constant 1 : i32
    %10 = arith.addi %arg0, %c1_i32 : i32
    %c1_i32_5 = arith.constant 1 : i32
    %11 = arith.andi %10, %c1_i32_5 : i32
    %12 = arith.index_cast %arg1 : i32 to index
    %13 = memref.load %arg4[%12] : memref<1xi32, #tpu.memory_space<smem>>
    %14 = arith.cmpi slt, %arg2, %13 : i32
    %15 = arith.extui %14 : i1 to i32
    %c0_i32_6 = arith.constant 0 : i32
    %16 = arith.cmpi ne, %15, %c0_i32_6 : i32
    scf.if %16 {
      %20 = arith.index_cast %arg1 : i32 to index
      %21 = arith.index_cast %arg2 : i32 to index
      %22 = memref.load %arg3[%20, %21] : memref<1x1xi32, #tpu.memory_space<smem>>
      %c128_i32 = arith.constant 128 : i32
      %23 = arith.muli %22, %c128_i32 : i32
      %24 = tpu.assume_multiple %23, 128 : i32
      %25 = arith.index_cast %11 : i32 to index
      %26 = arith.index_cast %24 : i32 to index
      %c0 = arith.constant 0 : index
      %27 = vector.load %arg18[%25, %26, %c0] : memref<2x128x128xbf16, #tpu.memory_space<vmem>>, vector<1x128x128xbf16>
      %28 = vector.shape_cast %27 : vector<1x128x128xbf16> to vector<128x128xbf16>
      %c0_9 = arith.constant 0 : index
      %c0_10 = arith.constant 0 : index
      %29 = vector.load %arg6[%c0_9, %c0_10] : memref<128x128xi8, #tpu.memory_space<vmem>>, vector<128x128xi8>
      %30 = arith.sitofp %29 : vector<128x128xi8> to vector<128x128xf32>
      %31 = arith.truncf %30 : vector<128x128xf32> to vector<128x128xbf16>
      %c0_11 = arith.constant 0 : index
      %c0_12 = arith.constant 0 : index
      %32 = vector.load %arg17[%c0_11, %c0_12] : memref<128x128xf32, #tpu.memory_space<vmem>>, vector<128x128xf32>
      %cst = arith.constant dense<0.000000e+00> : vector<128x128xf32>
      %33 = tpu.matmul %31, %28, %cst {dimension_numbers = #tpu.dot_dimension_numbers<[1], [0], [0], [1], [0, 0, 1, 1], [], []>} : vector<128x128xbf16>, vector<128x128xbf16>, vector<128x128xf32> -> vector<128x128xf32>
      %34 = arith.addf %32, %33 : vector<128x128xf32>
      %c0_13 = arith.constant 0 : index
      %c0_14 = arith.constant 0 : index
      %35 = vector.load %arg17[%c0_13, %c0_14] : memref<128x128xf32, #tpu.memory_space<vmem>>, vector<128x128xf32>
      tpu.vector_store %arg17[%c0_13, %c0_14], %34 {strides = array<i32>} : memref<128x128xf32, #tpu.memory_space<vmem>>, vector<128x128xf32>,
    } else {
    }
    %c0_i32_7 = arith.constant 0 : i32
    %17 = arith.cmpi eq, %arg2, %c0_i32_7 : i32
    %18 = arith.extui %17 : i1 to i32
    %c0_i32_8 = arith.constant 0 : i32
    %19 = arith.cmpi ne, %18, %c0_i32_8 : i32
    scf.if %19 {
      %c0 = arith.constant 0 : index
      %c0_9 = arith.constant 0 : index
      %20 = vector.load %arg17[%c0, %c0_9] : memref<128x128xf32, #tpu.memory_space<vmem>>, vector<128x128xf32>
      %21 = arith.truncf %20 : vector<128x128xf32> to vector<128x128xbf16>
      %c0_10 = arith.constant 0 : index
      %c0_11 = arith.constant 0 : index
      %c0_12 = arith.constant 0 : index
      %22 = vector.load %arg8[%c0_10, %c0_11, %c0_12] : memref<1x128x128xbf16, #tpu.memory_space<vmem>>, vector<1x128x128xbf16>
      %23 = vector.shape_cast %22 : vector<1x128x128xbf16> to vector<128x128xbf16>
      %cst = arith.constant dense<0.000000e+00> : vector<128x128xf32>
      %24 = tpu.matmul %21, %23, %cst {dimension_numbers = #tpu.dot_dimension_numbers<[1], [0], [0], [1], [0, 0, 1, 1], [], []>} : vector<128x128xbf16>, vector<128x128xbf16>, vector<128x128xf32> -> vector<128x128xf32>
      %c0_13 = arith.constant 0 : index
      %c0_14 = arith.constant 0 : index
      %c0_15 = arith.constant 0 : index
      %25 = vector.load %arg9[%c0_13, %c0_14, %c0_15] : memref<1x1x128xf32, #tpu.memory_space<vmem>>, vector<1x1x128xf32>
      %26 = vector.shape_cast %25 : vector<1x1x128xf32> to vector<1x128xf32>
      %27 = vector.broadcast %26 : vector<1x128xf32> to vector<128x128xf32>
      %28 = arith.addf %24, %27 : vector<128x128xf32>
      %cst_16 = arith.constant 0.000000e+00 : f32
      %29 = vector.broadcast %cst_16 : f32 to vector<128x128xf32>
      %30 = arith.maximumf %28, %29 : vector<128x128xf32>
      %31 = arith.truncf %30 : vector<128x128xf32> to vector<128x128xbf16>
      %c0_17 = arith.constant 0 : index
      %c0_18 = arith.constant 0 : index
      %c0_19 = arith.constant 0 : index
      %32 = vector.load %arg10[%c0_17, %c0_18, %c0_19] : memref<1x128x128xbf16, #tpu.memory_space<vmem>>, vector<1x128x128xbf16>
      %33 = vector.shape_cast %32 : vector<1x128x128xbf16> to vector<128x128xbf16>
      %cst_20 = arith.constant dense<0.000000e+00> : vector<128x128xf32>
      %34 = tpu.matmul %31, %33, %cst_20 {dimension_numbers = #tpu.dot_dimension_numbers<[1], [0], [0], [1], [0, 0, 1, 1], [], []>} : vector<128x128xbf16>, vector<128x128xbf16>, vector<128x128xf32> -> vector<128x128xf32>
      %c0_21 = arith.constant 0 : index
      %c0_22 = arith.constant 0 : index
      %c0_23 = arith.constant 0 : index
      %35 = vector.load %arg11[%c0_21, %c0_22, %c0_23] : memref<1x1x128xf32, #tpu.memory_space<vmem>>, vector<1x1x128xf32>
      %36 = vector.shape_cast %35 : vector<1x1x128xf32> to vector<1x128xf32>
      %37 = vector.broadcast %36 : vector<1x128xf32> to vector<128x128xf32>
      %38 = arith.addf %34, %37 : vector<128x128xf32>
      %c2_i32 = arith.constant 2 : i32
      %39 = arith.cmpi eq, %arg0, %c2_i32 : i32
      %cst_24 = arith.constant 0.000000e+00 : f32
      %40 = vector.broadcast %cst_24 : f32 to vector<128x128xf32>
      %41 = arith.maximumf %38, %40 : vector<128x128xf32>
      %42 = arith.select %39, %38, %41 : vector<128x128xf32>
      %c128_i32 = arith.constant 128 : i32
      %43 = arith.muli %arg1, %c128_i32 : i32
      %44 = tpu.assume_multiple %43, 128 : i32
      %45 = arith.truncf %42 : vector<128x128xf32> to vector<128x128xbf16>
      %c1_i32_25 = arith.constant 1 : i32
      %46 = arith.andi %arg0, %c1_i32_25 : i32
      %47 = arith.index_cast %46 : i32 to index
      %48 = arith.index_cast %44 : i32 to index
      %c0_26 = arith.constant 0 : index
      %49 = vector.load %arg18[%47, %48, %c0_26] : memref<2x128x128xbf16, #tpu.memory_space<vmem>>, vector<1x128x128xbf16>
      %50 = vector.shape_cast %49 : vector<1x128x128xbf16> to vector<128x128xbf16>
      %51 = vector.shape_cast %45 : vector<128x128xbf16> to vector<1x128x128xbf16>
      tpu.vector_store %arg18[%47, %48, %c0_26], %51 {strides = array<i32>} : memref<2x128x128xbf16, #tpu.memory_space<vmem>>, vector<1x128x128xbf16>,
      %c2_i32_27 = arith.constant 2 : i32
      %52 = arith.cmpi eq, %arg0, %c2_i32_27 : i32
      %53 = arith.extui %52 : i1 to i32
      %c0_i32_28 = arith.constant 0 : i32
      %54 = arith.cmpi ne, %53, %c0_i32_28 : i32
      scf.if %54 {
        %c0_32 = arith.constant 0 : index
        %c0_33 = arith.constant 0 : index
        %60 = vector.load %arg15[%c0_32, %c0_33] : memref<128x128xf32, #tpu.memory_space<vmem>>, vector<128x128xf32>
        tpu.vector_store %arg15[%c0_32, %c0_33], %42 {strides = array<i32>} : memref<128x128xf32, #tpu.memory_space<vmem>>, vector<128x128xf32>,
        %c0_34 = arith.constant 0 : index
        %c0_35 = arith.constant 0 : index
        %61 = vector.load %arg19[%c0_34, %c0_35] : memref<8x128xf32, #tpu.memory_space<vmem>>, vector<8x128xf32>
        %c0_36 = arith.constant 0 : index
        %c0_37 = arith.constant 0 : index
        %62 = vector.load %arg12[%c0_36, %c0_37] : memref<8x128xf32, #tpu.memory_space<vmem>>, vector<8x128xf32>
        %cst_38 = arith.constant dense<0.000000e+00> : vector<8x128xf32>
        %63 = tpu.matmul %62, %42, %cst_38 {dimension_numbers = #tpu.dot_dimension_numbers<[1], [0], [0], [1], [0, 0, 1, 1], [], []>} : vector<8x128xf32>, vector<128x128xf32>, vector<8x128xf32> -> vector<8x128xf32>
        %64 = arith.addf %61, %63 : vector<8x128xf32>
        %c0_39 = arith.constant 0 : index
        %c0_40 = arith.constant 0 : index
        %65 = vector.load %arg19[%c0_39, %c0_40] : memref<8x128xf32, #tpu.memory_space<vmem>>, vector<8x128xf32>
        tpu.vector_store %arg19[%c0_39, %c0_40], %64 {strides = array<i32>} : memref<8x128xf32, #tpu.memory_space<vmem>>, vector<8x128xf32>,
      } else {
      }
      %c2_i32_29 = arith.constant 2 : i32
      %55 = arith.cmpi eq, %arg0, %c2_i32_29 : i32
      %c0_i32_30 = arith.constant 0 : i32
      %56 = arith.cmpi eq, %arg1, %c0_i32_30 : i32
      %57 = arith.andi %55, %56 : i1
      %58 = arith.extui %57 : i1 to i32
      %c0_i32_31 = arith.constant 0 : i32
      %59 = arith.cmpi ne, %58, %c0_i32_31 : i32
      scf.if %59 {
        %c0_32 = arith.constant 0 : index
        %c0_33 = arith.constant 0 : index
        %60 = vector.load %arg19[%c0_32, %c0_33] : memref<8x128xf32, #tpu.memory_space<vmem>>, vector<8x128xf32>
        %c0_34 = arith.constant 0 : index
        %c0_35 = arith.constant 0 : index
        %61 = vector.load %arg13[%c0_34, %c0_35] : memref<128x128xf32, #tpu.memory_space<vmem>>, vector<128x128xf32>
        %cst_36 = arith.constant dense<0.000000e+00> : vector<8x128xf32>
        %62 = tpu.matmul %60, %61, %cst_36 {dimension_numbers = #tpu.dot_dimension_numbers<[1], [0], [0], [1], [0, 0, 1, 1], [], []>} : vector<8x128xf32>, vector<128x128xf32>, vector<8x128xf32> -> vector<8x128xf32>
        %c0_37 = arith.constant 0 : index
        %c0_38 = arith.constant 0 : index
        %63 = vector.load %arg14[%c0_37, %c0_38] : memref<1x128xf32, #tpu.memory_space<vmem>>, vector<1x128xf32>
        %64 = vector.broadcast %63 : vector<1x128xf32> to vector<8x128xf32>
        %65 = arith.addf %62, %64 : vector<8x128xf32>
        %c0_39 = arith.constant 0 : index
        %c0_40 = arith.constant 0 : index
        %66 = vector.load %arg16[%c0_39, %c0_40] : memref<8x128xf32, #tpu.memory_space<vmem>>, vector<8x128xf32>
        tpu.vector_store %arg16[%c0_39, %c0_40], %65 {strides = array<i32>} : memref<8x128xf32, #tpu.memory_space<vmem>>, vector<8x128xf32>,
      } else {
      }
    } else {
    }
    return
  }
  func.func @transform_1(%arg0: i32, %arg1: i32, %arg2: i32, %arg3: memref<1x1xi32, #tpu.memory_space<smem>>, %arg4: memref<1xi32, #tpu.memory_space<smem>>) -> (i32, i32) {
    %0 = arith.index_cast %arg1 : i32 to index
    %1 = arith.index_cast %arg2 : i32 to index
    %2 = memref.load %arg3[%0, %1] : memref<1x1xi32, #tpu.memory_space<smem>>
    %c0_i32 = arith.constant 0 : i32
    return %arg1, %2 : i32, i32
  }
  func.func @transform_2(%arg0: i32, %arg1: i32, %arg2: i32, %arg3: memref<1x1xi32, #tpu.memory_space<smem>>, %arg4: memref<1xi32, #tpu.memory_space<smem>>) -> (i32, i32, i32) {
    %c0_i32 = arith.constant 0 : i32
    %c0_i32_0 = arith.constant 0 : i32
    return %arg0, %arg1, %c0_i32 : i32, i32, i32
  }
  func.func @transform_3(%arg0: i32, %arg1: i32, %arg2: i32, %arg3: memref<1x1xi32, #tpu.memory_space<smem>>, %arg4: memref<1xi32, #tpu.memory_space<smem>>) -> (i32, i32, i32) {
    %c0_i32 = arith.constant 0 : i32
    %c0_i32_0 = arith.constant 0 : i32
    %c0_i32_1 = arith.constant 0 : i32
    return %arg0, %c0_i32, %c0_i32_0 : i32, i32, i32
  }
  func.func @transform_4(%arg0: i32, %arg1: i32, %arg2: i32, %arg3: memref<1x1xi32, #tpu.memory_space<smem>>, %arg4: memref<1xi32, #tpu.memory_space<smem>>) -> (i32, i32, i32) {
    %c0_i32 = arith.constant 0 : i32
    %c0_i32_0 = arith.constant 0 : i32
    %c0_i32_1 = arith.constant 0 : i32
    return %arg0, %c0_i32, %c0_i32_0 : i32, i32, i32
  }
  func.func @transform_5(%arg0: i32, %arg1: i32, %arg2: i32, %arg3: memref<1x1xi32, #tpu.memory_space<smem>>, %arg4: memref<1xi32, #tpu.memory_space<smem>>) -> (i32, i32, i32) {
    %c0_i32 = arith.constant 0 : i32
    %c0_i32_0 = arith.constant 0 : i32
    %c0_i32_1 = arith.constant 0 : i32
    return %arg0, %c0_i32, %c0_i32_0 : i32, i32, i32
  }
  func.func @transform_6(%arg0: i32, %arg1: i32, %arg2: i32, %arg3: memref<1x1xi32, #tpu.memory_space<smem>>, %arg4: memref<1xi32, #tpu.memory_space<smem>>) -> (i32, i32, i32) {
    %c0_i32 = arith.constant 0 : i32
    %c0_i32_0 = arith.constant 0 : i32
    %c0_i32_1 = arith.constant 0 : i32
    return %arg0, %c0_i32, %c0_i32_0 : i32, i32, i32
  }
  func.func @transform_7(%arg0: i32, %arg1: i32, %arg2: i32, %arg3: memref<1x1xi32, #tpu.memory_space<smem>>, %arg4: memref<1xi32, #tpu.memory_space<smem>>) -> (i32, i32) {
    %c2_i32 = arith.constant 2 : i32
    %0 = arith.cmpi eq, %arg0, %c2_i32 : i32
    %c0_i32 = arith.constant 0 : i32
    %1 = arith.select %0, %arg1, %c0_i32 : i32
    %c0_i32_0 = arith.constant 0 : i32
    %c0_i32_1 = arith.constant 0 : i32
    return %c0_i32_0, %1 : i32, i32
  }
  func.func @transform_8(%arg0: i32, %arg1: i32, %arg2: i32, %arg3: memref<1x1xi32, #tpu.memory_space<smem>>, %arg4: memref<1xi32, #tpu.memory_space<smem>>) -> (i32, i32) {
    %c0_i32 = arith.constant 0 : i32
    %c0_i32_0 = arith.constant 0 : i32
    %c0_i32_1 = arith.constant 0 : i32
    return %c0_i32, %c0_i32_0 : i32, i32
  }
  func.func @transform_9(%arg0: i32, %arg1: i32, %arg2: i32, %arg3: memref<1x1xi32, #tpu.memory_space<smem>>, %arg4: memref<1xi32, #tpu.memory_space<smem>>) -> (i32, i32) {
    %c0_i32 = arith.constant 0 : i32
    %c0_i32_0 = arith.constant 0 : i32
    %c0_i32_1 = arith.constant 0 : i32
    return %c0_i32, %c0_i32_0 : i32, i32
  }
  func.func @transform_10(%arg0: i32, %arg1: i32, %arg2: i32, %arg3: memref<1x1xi32, #tpu.memory_space<smem>>, %arg4: memref<1xi32, #tpu.memory_space<smem>>) -> (i32, i32) {
    %c2_i32 = arith.constant 2 : i32
    %0 = arith.cmpi eq, %arg0, %c2_i32 : i32
    %c0_i32 = arith.constant 0 : i32
    %1 = arith.select %0, %arg1, %c0_i32 : i32
    %c0_i32_0 = arith.constant 0 : i32
    %c0_i32_1 = arith.constant 0 : i32
    return %1, %c0_i32_0 : i32, i32
  }
  func.func @transform_11(%arg0: i32, %arg1: i32, %arg2: i32, %arg3: memref<1x1xi32, #tpu.memory_space<smem>>, %arg4: memref<1xi32, #tpu.memory_space<smem>>) -> (i32, i32) {
    %c0_i32 = arith.constant 0 : i32
    %c0_i32_0 = arith.constant 0 : i32
    %c0_i32_1 = arith.constant 0 : i32
    return %c0_i32, %c0_i32_0 : i32, i32
  }
}

</mosaic_0001>

<bundles_post_ra>
// kernel: tpu_custom_call.1
= control target key start
LH: loop header
LB: loop body
LE: loop exit
PB: predicated region body
PF: predicated region fallthrough
CT: control target
= control target key end

     0   :  { %s3284_s0 = inlined_call_operand.<no memory space> [shape: s32[1,1], index: 0, kind: input, shape index: {}]   ;;  %s3285_s1 = inlined_call_operand.<no memory space> [shape: s32[1], index: 1, kind: input, shape index: {}]   ;;  %s3286_s2 = inlined_call_operand.hbm [shape: bf16[128,128], index: 2, kind: input, shape index: {}]   ;;  %s3287_s3 = inlined_call_operand.hbm [shape: s8[128,128], index: 3, kind: input, shape index: {}]   ;;  %s3288_s4 = inlined_call_operand.hbm [shape: bf16[3,128,128], index: 4, kind: input, shape index: {}]   ;;  %s3289_s5 = inlined_call_operand.hbm [shape: bf16[3,128,128], index: 5, kind: input, shape index: {}]   ;;  %s3290_s6 = inlined_call_operand.vmem [shape: f32[3,1,128], index: 6, kind: input, shape index: {}]   ;;  %s3291_s7 = inlined_call_operand.hbm [shape: bf16[3,128,128], index: 7, kind: input, shape index: {}]   ;;  %s3292_s8 = inlined_call_operand.vmem [shape: f32[3,1,128], index: 8, kind: input, shape index: {}]   ;;  %s3293_s9 = inlined_call_operand.vmem [shape: f32[8,128], index: 9, kind: input, shape index: {}]   ;;  %s3294_s10 = inlined_call_operand.hbm [shape: f32[128,128], index: 10, kind: input, shape index: {}]   ;;  %s3295_s11 = inlined_call_operand.vmem [shape: f32[1,128], index: 11, kind: input, shape index: {}]   ;;  %s3296_s12 = inlined_call_operand.hbm [shape: f32[128,128], index: 12, kind: output, shape index: {0}]   ;;  %s3297_s13 = inlined_call_operand.hbm [shape: f32[8,128], index: 13, kind: output, shape index: {1}]  }
   0x1   :  { %3321 = sst [smem:[#allocation37_spill]] %s3286_s2 }
   0x2   :  { %3322 = sst [smem:[#allocation38_spill]] %s3288_s4 }
   0x3   :  { %3323 = sst [smem:[#allocation39_spill]] %s3290_s6 }
   0x4   :  { %3324 = sst [smem:[#allocation40_spill]] %s3292_s8 }
   0x5   :  { %3325 = sst [smem:[#allocation41_spill]] %s3293_s9 }
   0x6   :  { %3326 = sst [smem:[#allocation42_spill]] %s3294_s10 }
   0x7   :  { %3327 = sst [smem:[#allocation43_spill]] %s3295_s11 }
   0x8   :  { %3328 = sst [smem:[#allocation44_spill]] %s3296_s12 }
   0x9   :  { %3329 = sst [smem:[#allocation45_spill]] %s3297_s13 }
   0xa   :  { %19 = sst [smem:[#allocation6]] %s3284_s0 }
   0xb   :  { %20 = sst [smem:[#allocation7]] %s3285_s1 }
   0xc   :  { %21 = vsyncpa [#allocation9], 0 }
   0xd   :  { %22 = vsyncpa [#allocation12], 0 }
   0xe   :  { %24 = vsyncpa [#allocation12 + $0x1], 0 }
   0xf   :  { %25 = vsyncpa [#allocation15], 0 }
  0x10   :  { %27 = vsyncpa [#allocation15 + $0x1], 0 }
  0x11   :  { %28 = vsyncpa [#allocation10], 0 }
  0x12   :  { %30 = vsyncpa [#allocation10 + $0x1], 0 }
  0x13   :  { %31 = vsyncpa [#allocation19], 0  ;;  %s2741_s29 = smov 0   ;;  %s2743_s30 = smov 0  }
  0x14   :  { %s2745_s14 = smov 0   ;;  %s2747_s15 = smov 0  }
  0x15   :  { %s2749_s0 = smov 0   ;;  %s2751_s16 = smov 0  }
  0x16   :  { %s2753_s1 = smov 0   ;;  %s2755_s17 = smov 0  }
  0x17 LB: > { %3330 = sst [smem:[#allocation32_spill]] %s2621_s14  ;;  %s2778_s18 = sadd.s32 4294967295, %s2641_s17   ;;  %s2641_s17 = sphi %s2755_s17, %s37_s17   ;;  %s2637_s1 = sphi %s2753_s1, %s3375_s1   ;;  %s2633_s16 = sphi %s2751_s16, %s3374_s16   ;;  %s2629_s0 = sphi %s2749_s0, %s3274_s0   ;;  %s2625_s15 = sphi %s2747_s15, %s3373_s15   ;;  %s2621_s14 = sphi %s2745_s14, %s3372_s14   ;;  %s2617_s30 = sphi %s2743_s30, %s3377_s30   ;;  %s2613_s29 = sphi %s2741_s29, %s3376_s29  }
  0x18   : > { %3331 = sst [smem:[#allocation33_spill]] %s2629_s0  ;;  %p94_p0 = scmp.ne.s32.totalorder %s2629_s0, %s2625_s15 }
  0x19   : > { %3332 = sst [smem:[#allocation34_spill]] %s2637_s1  ;;  %p3300_p1 = scmp.eq.s32.totalorder %s2778_s18, 0 }
  0x1a   : > { %p122_p2 = scmp.ne.s32.totalorder %s2617_s30, %s2613_s29  ;;  %p1759_p3 = scmp.ge.s32.totalorder %s2641_s17, 1 }
  0x1b   : > { %p2787_p4 = por %p3300_p1, %p94_p0  ;;  %p360_p5 = scmp.lt.s32.totalorder %s2641_s17, 4 }
  0x1c   : > { %p2794_p6 = por %p122_p2, %p3300_p1  ;;  %s2643_s23 = smov [#allocation16]  }
  0x1d   : > { %s3333_s20 = scalar_select %p2787_p4, 1, 0 }
  0x1e   : > { %s3334_s21 = scalar_select %p2794_p6, 1, 0 }
  0x1f   : > { %p2798_p7 = pnand %p1759_p3, %p360_p5  ;;  %s397_s24 = sshll.u32 %s2643_s23, 4  ;;  %s398_s24 = int_to_ptr.vmem [resolvable:$true] %s397_s24 }
  0x20   : > { %s3338_s10 = sld [smem:[#allocation42_spill]] }
  0x21   : > { %s3335_s22 = scalar_select %p2798_p7, 1, 0 }
  0x22   : > { %p2192_p8 = pneg %p2798_p7 }
  0x24   : > { %p2806_p9 = pnand %p2192_p8, %p2787_p4  ;;  %p2812_p10 = pnand %p2192_p8, %p3300_p1 }
  0x26   : > { %s3336_s25 = scalar_select %p2806_p9, 1, 0 }
  0x27   : > { %s2327_s29 = scalar_lea.hbm %s3338_s10, 2048  ;;  %p2329_p12 = pneg %p2812_p10 }
  0x28   : > { %p2328_p11 = scmp.ne.s32.totalorder %s3338_s10, %s2327_s29  ;;  %p2334_p2 = scmp.lt.u32.totalorder %s2327_s29, %s3338_s10 }
  0x2a   : > { %p2330_p13 = pnand %p2329_p12, %p2328_p11 }
  0x2c   : > { %p2331_p0 = pneg %p2330_p13 }
  0x2e   : > { %p2336_p3 = pnand %p2334_p2, %p2331_p0 }
  0x30   : > { %2339 = shalt.err (!%p2336_p3)
}
  0x31   : > { %s2340_s13 = scalar_lea.vmem %s398_s24, 2048  ;;  %p2348_p6 = scmp.lt.s32.totalorder %s398_s24, %s398_s24 }
  0x32   : > { %p2341_p5 = scmp.ne.s32.totalorder %s398_s24, %s2340_s13  ;;  %p2349_p4 = scmp.lt.s32.totalorder %s2340_s13, %s2340_s13 }
  0x34   : > { %p2343_p8 = pnand %p2341_p5, %p2329_p12  ;;  %p2350_p7 = por %p2349_p4, %p2348_p6 }
  0x36   : > { %p2344_p1 = pneg %p2343_p8 }
  0x38   : > { %p2351_p9 = pnand %p2350_p7, %p2344_p1 }
  0x3a   : > { %2354 = shalt.err (!%p2351_p9)
}
  0x3b   : > { %s3307_s19 = smov 128   ;;  %s3308_s0 = smov 8  }
  0x3c   : > { %2198 = dma.hbm_to_vmem [thread:$0]  (!%p2812_p10), %s3338_s10, 2048, %s398_s24, [#allocation15], %s3307_s19, %s3307_s19, %s3308_s0  }
  0x3d   : > { %s56_s28 = sadd.s32 1, %s2637_s1  ;;  %s109_s29 = sadd.s32 1, %s2621_s14 }
  0x3e   : > { %p58_p1 = scmp.ge.s32.totalorder %s56_s28, 3  ;;  %p116_p4 = scmp.ne.s32.totalorder %s2621_s14, %s2617_s30 }
  0x3f   : > { %p117_p6 = scmp.eq.s32.totalorder %s2641_s17, 0  ;;  %p2214_p7 = scmp.lt.s32.totalorder %s2641_s17, 3 }
  0x40   : > { %s3379_s28 = smov (%p58_p1, %s56_s28), 0  ;;  %s416_s23 = sand.u32 1, %s2621_s14  }
  0x41   : > { %3339 = sst [smem:[#allocation35_spill]] %s3379_s28  ;;  %p118_p9 = por %p117_p6, %p116_p4 }
  0x42   : > { %s104_s15 = ssub.s32 %s2637_s1, %s3379_s28  ;;  %s2847_s12 = sshll.u32 %s416_s23, 6 }
  0x43   : > { %p107_p11 = scmp.eq.s32.totalorder %s104_s15, 0  ;;  %s2850_s24 = sshll.u32 %s2637_s1, 10 }
  0x44   : > { %s3341_s4 = sld [smem:[#allocation38_spill]]  ;;  %s418_s26 = scalar_lea.vmem [#allocation11], %s2847_s12 }
  0x45   : > { %s2853_s13 = scalar_select %p107_p11, %s2621_s14, %s109_s29  }
  0x46   : > { %s427_s15 = sshll.u32 %s418_s26, 4  ;;  %p2864_p10 = pnand %p2214_p7, %p118_p9  ;;  %s2868_s15 = int_to_ptr.vmem [resolvable:$true] %s427_s15 }
  0x47   : > { %3340 = sst [smem:[#allocation36_spill]] %s2853_s13  ;;  %s3343_s29 = sand.u32 1, %s2641_s17  }
  0x48   : > { %s3342_s23 = scalar_select %p2864_p10, 1, 0 }
  0x49   : > { %s2872_s10 = scalar_lea.sflag [#allocation12], %s3343_s29  ;;  %p2878_p13 = pneg %p2864_p10 }
  0x4a   : > { %s2859_s0 = scalar_lea.hbm %s3341_s4, %s2850_s24  ;;  %s2360_s1 = scalar_lea.hbm %s3341_s4, 3072 }
  0x4b   : > { %s2355_s19 = scalar_lea.hbm %s2859_s0, 1024  ;;  %p2361_p3 = scmp.lt.u32.totalorder %s2859_s0, %s3341_s4 }
  0x4c   : > { %p2356_p12 = scmp.ne.s32.totalorder %s2859_s0, %s2355_s19  ;;  %p2362_p5 = scmp.lt.u32.totalorder %s2360_s1, %s2355_s19 }
  0x4d   : > { %s3344_s27 = scalar_select %p2878_p13, 1, 0 }
  0x4e   : > { %p2358_p0 = pnand %p2878_p13, %p2356_p12  ;;  %p2363_p8 = por %p2362_p5, %p2361_p3 }
  0x4f   : > { %p2364_p1 = scmp.lt.u32.totalorder %s2355_s19, %s2859_s0 }
  0x50   : > { %p2359_p2 = pneg %p2358_p0 }
  0x51   : > { %p2365_p4 = por %p2364_p1, %p2363_p8 }
  0x53   : > { %p2366_p6 = pnand %p2365_p4, %p2359_p2 }
  0x55   : > { %2369 = shalt.err (!%p2366_p6)
}
  0x56   : > { %s2370_s29 = scalar_lea.vmem %s2868_s15, 1024  ;;  %s2646_s28 = smov [#allocation11]  }
  0x57   : > { %p2371_p7 = scmp.ne.s32.totalorder %s2868_s15, %s2370_s29  ;;  %s2375_s26 = sshll.u32 %s2646_s28, 4  ;;  %s2376_s26 = int_to_ptr.vmem [resolvable:$false] %s2375_s26 }
  0x58   : > { %s2377_s14 = scalar_lea.vmem %s2376_s26, 2048  ;;  %p2378_p12 = scmp.lt.s32.totalorder %s2868_s15, %s2376_s26 }
  0x59   : > { %p2373_p9 = pnand %p2371_p7, %p2878_p13  ;;  %p2379_p0 = scmp.lt.s32.totalorder %s2377_s14, %s2370_s29 }
  0x5b   : > { %p2374_p11 = pneg %p2373_p9  ;;  %p2380_p3 = por %p2379_p0, %p2378_p12 }
  0x5d   : > { %p2381_p5 = pnand %p2380_p3, %p2374_p11 }
  0x5f   : > { %2384 = shalt.err (!%p2381_p5)
}
  0x60   : > { %s3313_s1 = smov 64   ;;  %s3315_s13 = smov 4  }
  0x61   : > { %2202 = dma.hbm_to_vmem [thread:$0]  (!%p2864_p10), %s2859_s0, 1024, %s2868_s15, %s2872_s10, %s3313_s1, %s3313_s1, %s3315_s13  }
  0x62   : > { %s67_s19 = sld [smem:[#allocation6]]  ;;  %s2649_s29 = smov [#allocation8]  }
  0x63   : > { %s384_s28 = sshll.u32 %s2649_s29, 4  ;;  %s2911_s4 = scalar_lea.hbm %s3289_s5, %s2850_s24  ;;  %s2905_s28 = int_to_ptr.vmem [resolvable:$true] %s384_s28 }
  0x64   : > { %s441_s11 = scalar_lea.vmem [#allocation13], %s2847_s12  ;;  %s2920_s6 = scalar_lea.hbm %s3291_s7, %s2850_s24 }
  0x65   : > { %s448_s9 = sshll.u32 %s441_s11, 4  ;;  %p3345_p8 = scmp.ne.s32.totalorder %s3336_s25, 0  ;;  %s2914_s9 = int_to_ptr.vmem [resolvable:$true] %s448_s9 }
  0x66   : > { %s2390_s14 = scalar_lea.hbm %s3287_s3, 512 }
  0x67   : > { %p2387_p1 = pneg %p3345_p8 }
  0x68   : > { %s1760_s0 = sshll.u32 %s67_s19, 7 }
  0x69   : > { %s383_s29 = scalar_lea.hbm %s3287_s3, %s1760_s0 }
  0x6a   : > { %s2385_s13 = scalar_lea.hbm %s383_s29, 512  ;;  %p2391_p7 = scmp.lt.u32.totalorder %s383_s29, %s3287_s3 }
  0x6b   : > { %p2386_p2 = scmp.ne.s32.totalorder %s383_s29, %s2385_s13  ;;  %p2392_p9 = scmp.lt.u32.totalorder %s2390_s14, %s2385_s13 }
  0x6c   : > { %p2394_p12 = scmp.lt.u32.totalorder %s2385_s13, %s383_s29 }
  0x6d   : > { %p2388_p4 = pnand %p2387_p1, %p2386_p2  ;;  %p2393_p11 = por %p2392_p9, %p2391_p7 }
  0x6f   : > { %p2389_p6 = pneg %p2388_p4  ;;  %p2395_p0 = por %p2394_p12, %p2393_p11 }
  0x71   : > { %p2396_p3 = pnand %p2395_p0, %p2389_p6 }
  0x73   : > { %2399 = shalt.err (!%p2396_p3)
}
  0x74   : > { %s2400_s24 = scalar_lea.vmem %s2905_s28, 512  ;;  %p2408_p10 = scmp.lt.s32.totalorder %s2905_s28, %s2905_s28 }
  0x75   : > { %p2401_p5 = scmp.ne.s32.totalorder %s2905_s28, %s2400_s24  ;;  %p2409_p13 = scmp.lt.s32.totalorder %s2400_s24, %s2400_s24 }
  0x77   : > { %p2403_p2 = pnand %p2401_p5, %p2387_p1  ;;  %p2410_p7 = por %p2409_p13, %p2408_p10 }
  0x79   : > { %p2404_p4 = pneg %p2403_p2 }
  0x7b   : > { %p2411_p9 = pnand %p2410_p7, %p2404_p4 }
  0x7d   : > { %2414 = shalt.err (!%p2411_p9)
}
  0x7e   : > { %s3346_s1 = smov 8   ;;  %s3347_s13 = smov 128  }
  0x7f   : > { %2195 = dma.hbm_to_vmem [thread:$0]  (!%p3345_p8), %s383_s29, 512, %s2905_s28, [#allocation9], %s3347_s13, %s3347_s13, %s3346_s1  }
  0x80   : > { %s2415_s19 = scalar_lea.hbm %s2911_s4, 1024  ;;  %p3348_p6 = scmp.ne.s32.totalorder %s3344_s27, 0 }
  0x81   : > { %p2416_p1 = scmp.ne.s32.totalorder %s2911_s4, %s2415_s19  ;;  %s2420_s11 = scalar_lea.hbm %s3289_s5, 3072 }
  0x82   : > { %p2421_p10 = scmp.lt.u32.totalorder %s2911_s4, %s3289_s5  ;;  %p2422_p13 = scmp.lt.u32.totalorder %s2420_s11, %s2415_s19 }
  0x83   : > { %p2418_p11 = pnand %p2416_p1, %p3348_p6  ;;  %p2424_p3 = scmp.lt.u32.totalorder %s2415_s19, %s2911_s4 }
  0x84   : > { %p2423_p0 = por %p2422_p13, %p2421_p10 }
  0x85   : > { %p2419_p12 = pneg %p2418_p11 }
  0x86   : > { %p2425_p5 = por %p2424_p3, %p2423_p0 }
  0x88   : > { %p2426_p2 = pnand %p2425_p5, %p2419_p12 }
  0x8a   : > { %2429 = shalt.err (!%p2426_p2)
}
  0x8b   : > { %s2430_s28 = scalar_lea.vmem %s2914_s9, 1024  ;;  %s2650_s29 = smov [#allocation13]  }
  0x8c   : > { %p2431_p8 = scmp.ne.s32.totalorder %s2914_s9, %s2430_s28  ;;  %s2435_s14 = sshll.u32 %s2650_s29, 4  ;;  %s2436_s14 = int_to_ptr.vmem [resolvable:$false] %s2435_s14 }
  0x8d   : > { %s2437_s2 = scalar_lea.vmem %s2436_s14, 2048  ;;  %p2438_p9 = scmp.lt.s32.totalorder %s2914_s9, %s2436_s14 }
  0x8e   : > { %p2433_p4 = pnand %p2431_p8, %p3348_p6  ;;  %p2439_p1 = scmp.lt.s32.totalorder %s2437_s2, %s2430_s28 }
  0x90   : > { %p2434_p7 = pneg %p2433_p4  ;;  %p2440_p11 = por %p2439_p1, %p2438_p9 }
  0x92   : > { %p2441_p10 = pnand %p2440_p11, %p2434_p7 }
  0x94   : > { %2444 = shalt.err (!%p2441_p10)
}
  0x95   : > { %p3349_p12 = scmp.ne.s32.totalorder %s3342_s23, 0  ;;  %s3350_s8 = smov 4  }
  0x96   : > { %s3351_s24 = smov 64   ;;  %s468_s1 = scalar_lea.vmem [#allocation14], %s2847_s12 }
  0x97   : > { %2205 = dma.hbm_to_vmem [thread:$0]  (!%p3349_p12), %s2911_s4, 1024, %s2914_s9, %s2872_s10, %s3351_s24, %s3351_s24, %s3350_s8  }
  0x98   : > { %s475_s13 = sshll.u32 %s468_s1, 4  ;;  %s3352_s19 = sand.u32 1, %s2641_s17   ;;  %s2975_s13 = int_to_ptr.vmem [resolvable:$true] %s475_s13 }
  0x99   : > { %s2979_s0 = scalar_lea.sflag [#allocation15], %s3352_s19  ;;  %s2445_s15 = scalar_lea.hbm %s2920_s6, 1024 }
  0x9a   : > { %p2446_p13 = scmp.ne.s32.totalorder %s2920_s6, %s2445_s15  ;;  %s2450_s26 = scalar_lea.hbm %s3291_s7, 3072 }
  0x9b   : > { %p2451_p5 = scmp.lt.u32.totalorder %s2920_s6, %s3291_s7  ;;  %p2452_p2 = scmp.lt.u32.totalorder %s2450_s26, %s2445_s15 }
  0x9c   : > { %p2448_p0 = pnand %p2446_p13, %p3348_p6  ;;  %p2454_p4 = scmp.lt.u32.totalorder %s2445_s15, %s2920_s6 }
  0x9d   : > { %p2453_p8 = por %p2452_p2, %p2451_p5 }
  0x9e   : > { %p2449_p3 = pneg %p2448_p0 }
  0x9f   : > { %p2455_p7 = por %p2454_p4, %p2453_p8 }
  0xa1   : > { %p2456_p9 = pnand %p2455_p7, %p2449_p3 }
  0xa3   : > { %2459 = shalt.err (!%p2456_p9)
}
  0xa4   : > { %s2460_s4 = scalar_lea.vmem %s2975_s13, 1024  ;;  %s2651_s9 = smov [#allocation14]  }
  0xa5   : > { %p2461_p1 = scmp.ne.s32.totalorder %s2975_s13, %s2460_s4  ;;  %s2465_s10 = sshll.u32 %s2651_s9, 4  ;;  %s2466_s10 = int_to_ptr.vmem [resolvable:$false] %s2465_s10 }
  0xa6   : > { %s2467_s12 = scalar_lea.vmem %s2466_s10, 2048  ;;  %p2468_p13 = scmp.lt.s32.totalorder %s2975_s13, %s2466_s10 }
  0xa7   : > { %p2463_p11 = pnand %p2461_p1, %p3348_p6  ;;  %p2469_p0 = scmp.lt.s32.totalorder %s2467_s12, %s2460_s4 }
  0xa9   : > { %p2464_p10 = pneg %p2463_p11  ;;  %p2470_p5 = por %p2469_p0, %p2468_p13 }
  0xab   : > { %p2471_p2 = pnand %p2470_p5, %p2464_p10 }
  0xad   : > { %2474 = shalt.err (!%p2471_p2)
}
  0xae   : > { %2208 = dma.hbm_to_vmem [thread:$0]  (!%p3349_p12), %s2920_s6, 1024, %s2975_s13, %s2979_s0, %s3351_s24, %s3351_s24, %s3350_s8  }
  0xaf   : > { %p3353_p6 = scmp.ne.s32.totalorder %s3335_s22, 0 }
  0xb0   : > { %p3354_p3 = scmp.ne.s32.totalorder (!%p3353_p6), %s3333_s20, 0 }
  0xb1   : > { %504 = sbr.rel (%p3353_p6) target bundleno = 1560 (0x618), region = 56 }
  0xb8   : > { %2586 = dma.done.wait (%p3354_p3), [#allocation9], 512  }
  0xb9   : > { %2588 = vsyncadd (%p3354_p3), [#allocation9], 4294966784  ;;  %s510_s23 = sand.u32 1, %s2778_s18   ;;  %s512_s27 = sand.u32 1, %s2617_s30  }
  0xba   : > { %s1774_s14 = sshll.u32 %s512_s27, 6  ;;  %s511_s2 = scalar_lea.sflag [#allocation12], %s510_s23 }
  0xbb   : > { %s3014_s1 = scalar_lea.vmem [#allocation11], %s1774_s14  ;;  %p3355_p8 = scmp.ne.s32.totalorder %s3334_s21, 0 }
  0xbd   : > { %2590 = dma.done.wait (%p3355_p8), %s511_s2, 2048  }
  0xbe   : > { %2592 = vsyncadd (%p3355_p8), %s511_s2, 4294965248  ;;  %s3020_s6 = scalar_lea.vmem [#allocation13], %s1774_s14  ;;  %s529_s22 = scalar_lea.sflag [#allocation15], %s510_s23 }
  0xbf   : > { %s3022_s20 = scalar_lea.vmem [#allocation14], %s1774_s14 }
  0xc0   : > { %2594 = dma.done.wait (%p3355_p8), %s529_s22, 1024  }
  0xc1   : > { %2596 = vsyncadd (%p3355_p8), %s529_s22, 4294966272  ;;  %p3356_p12 = scmp.eq.s32.totalorder %s2778_s18, 0 }
  0xc3   : > { %2598 = dma.done.wait (%p3356_p12), [#allocation15], 2048   ;;  %p3357_p4 = pmov %p3356_p12 }
  0xc4   : > { %p605_p7 = scmp.lt.s32.totalorder %s2633_s16, 2  ;;  %p623_p9 = scmp.eq.s32.totalorder %s2633_s16, 0 }
  0xc5   : > { %2600 = vsyncadd (%p3357_p4), [#allocation15], 4294965248  ;;  %s3358_s19 = sld [smem:[#allocation39_spill]]  ;;  %s3359_s11 = sld [smem:[#allocation40_spill]]  ;;  %v2652_v0 = vmov (%p623_p9), 0.0  }
  0xc6   : > { %s3035_s8 = scalar_select %p605_p7, %s2633_s16, 2 }
  0xc7   : > { %631 = sbr.rel (!%p623_p9) target bundleno = 231 (0xe7), region = 80  ;;  %632 = vst [vmem:[#allocation4] sm:$0xff] (%p623_p9), %v2652_v0 }
  0xcb   : > { %s607_s21 = scalar_lea.vmem %s3358_s19, %s3035_s8  ;;  %s610_s25 = scalar_lea.vmem %s3359_s11, %s3035_s8 }
  0xce   : > { %s2653_s26 = smov [#allocation3 + $0x40]   ;;  %s3360_s9 = sld [smem:[#allocation37_spill]] }
  0xcf   : > { %s641_s28 = sshll.u32 %s2653_s26, 4  ;;  %s642_s28 = int_to_ptr.vmem [resolvable:$true] %s641_s28 }
  0xd4   : > { %s2475_s10 = scalar_lea.hbm %s3360_s9, 1024 }
  0xd5   : > { %p2476_p1 = scmp.ne.s32.totalorder %s3360_s9, %s2475_s10  ;;  %p2479_p11 = scmp.lt.u32.totalorder %s2475_s10, %s3360_s9 }
  0xd7   : > { %p2481_p10 = pnand %p2479_p11, %p2476_p1 }
  0xd9   : > { %2484 = shalt.err (!%p2481_p10)  }
  0xda   : > { %s2485_s2 = scalar_lea.vmem %s642_s28, 1024  ;;  %s2654_s22 = smov [#allocation3]  }
  0xdb   : > { %p2486_p13 = scmp.ne.s32.totalorder %s642_s28, %s2485_s2  ;;  %s2487_s24 = sshll.u32 %s2654_s22, 4  ;;  %s2488_s24 = int_to_ptr.vmem [resolvable:$false] %s2487_s24 }
  0xdc   : > { %s2489_s13 = scalar_lea.vmem %s2488_s24, 2048  ;;  %p2490_p0 = scmp.lt.s32.totalorder %s642_s28, %s2488_s24 }
  0xdd   : > { %p2491_p5 = scmp.lt.s32.totalorder %s2489_s13, %s2485_s2 }
  0xdf   : > { %p2492_p2 = por %p2491_p5, %p2490_p0 }
  0xe1   : > { %p2493_p6 = pnand %p2492_p2, %p2486_p13 }
  0xe3   : > { %2496 = shalt.err (!%p2493_p6)  }
  0xe4   : > { %644 = dma.hbm_to_vmem [thread:$0]  %s3360_s9, 1024, %s642_s28, [#allocation20] }
  0xe5   : > { %2601 = dma.done.wait [#allocation20], 1024 }
  0xe6   : > { %2602 = vsyncadd [#allocation20], 4294966272 }
  0xe7 PF: > { %v1822_v1 = vld [vmem:[%s3014_s1] sm:$0xff]   ;;  %v1853_v2 = vld [vmem:[%s3014_s1 + $0x8] sm:$0xff]   ;;  %v1854_v3 = vld [vmem:[%s3014_s1 + $0x10] sm:$0xff]   ;;  %s700_s15 = sadd.s32 1, %s2633_s16  ;;  %s3061_s11 = sld [smem:[#allocation7]] }
  0xe8   : > { %v1823_v4 = vunpack.c.l.bf16 %v1822_v1  ;;  %v1824_v5 = vunpack.c.h.bf16 %v1822_v1  ;;  %v1827_v6 = vunpack.c.l.bf16 %v1853_v2  ;;  %v1828_v7 = vunpack.c.h.bf16 %v1853_v2  ;;  %v1855_v8 = vld [vmem:[%s3014_s1 + $0x18] sm:$0xff]   ;;  %v1856_v9 = vld [vmem:[%s3014_s1 + $0x20] sm:$0xff]   ;;  %v1857_v10 = vld [vmem:[%s3014_s1 + $0x28] sm:$0xff]   ;;  %s3066_s26 = sand.u32 1, %s700_s15 }
  0xe9   : > { %v1831_v11 = vunpack.c.l.bf16 %v1854_v3  ;;  %v1832_v12 = vunpack.c.h.bf16 %v1854_v3  ;;  %v1835_v13 = vunpack.c.l.bf16 %v1855_v8  ;;  %v1836_v14 = vunpack.c.h.bf16 %v1855_v8  ;;  %v1858_v15 = vld [vmem:[%s3014_s1 + $0x30] sm:$0xff]   ;;  %v1859_v16 = vld [vmem:[%s3014_s1 + $0x38] sm:$0xff]  }
  0xea   : > { %684 = vst [vmem:[#allocation2] sm:$0xff] %v1823_v4  ;;  %685 = vst [vmem:[#allocation2 + $0x8] sm:$0xff] %v1824_v5  ;;  %v1839_v17 = vunpack.c.l.bf16 %v1856_v9  ;;  %v1840_v18 = vunpack.c.h.bf16 %v1856_v9  ;;  %v1843_v19 = vunpack.c.l.bf16 %v1857_v10  ;;  %v1844_v20 = vunpack.c.h.bf16 %v1857_v10 }
  0xeb   : > { %686 = vst [vmem:[#allocation2 + $0x10] sm:$0xff] %v1827_v6  ;;  %687 = vst [vmem:[#allocation2 + $0x18] sm:$0xff] %v1828_v7  ;;  %v1847_v21 = vunpack.c.l.bf16 %v1858_v15  ;;  %v1848_v22 = vunpack.c.h.bf16 %v1858_v15  ;;  %v1851_v23 = vunpack.c.l.bf16 %v1859_v16  ;;  %v1852_v24 = vunpack.c.h.bf16 %v1859_v16 }
  0xec   : > { %688 = vst [vmem:[#allocation2 + $0x20] sm:$0xff] %v1831_v11  ;;  %689 = vst [vmem:[#allocation2 + $0x28] sm:$0xff] %v1832_v12 }
  0xed   : > { %690 = vst [vmem:[#allocation2 + $0x30] sm:$0xff] %v1835_v13  ;;  %691 = vst [vmem:[#allocation2 + $0x38] sm:$0xff] %v1836_v14  ;;  %p1781_p3 = scmp.le.s32.totalorder %s3061_s11, 0 }
  0xee   : > { %692 = vst [vmem:[#allocation2 + $0x40] sm:$0xff] %v1839_v17  ;;  %693 = vst [vmem:[#allocation2 + $0x48] sm:$0xff] %v1840_v18  ;;  %s714_s1 = sld [smem:[#allocation6]] (!%p1781_p3)  ;;  %v730_v25 = vld [vmem:[#allocation8] sm:$0xff] (!%p1781_p3)  ;;  %v732_v26 = vld [vmem:[#allocation8 + $0x10] sm:$0xff] (!%p1781_p3)  ;;  %s1783_s28 = sshll.u32 (!%p1781_p3), %s3066_s26, 3 }
  0xef   : > { %694 = vst [vmem:[#allocation2 + $0x50] sm:$0xff] %v1843_v19  ;;  %695 = vst [vmem:[#allocation2 + $0x58] sm:$0xff] %v1844_v20  ;;  %706 = sbr.rel (%p1781_p3) target bundleno = 508 (0x1fc), region = 93  ;;  %v734_v27 = vunpack.c.l.s8.bf16 (!%p1781_p3), %v730_v25  ;;  %v738_v28 = vunpack.c.l.s8.bf16 (!%p1781_p3), %v732_v26  ;;  %v731_v37 = vld [vmem:[#allocation8 + $0x8] sm:$0xff] (!%p1781_p3)  ;;  %v733_v38 = vld [vmem:[#allocation8 + $0x18] sm:$0xff] (!%p1781_p3)  ;;  %v735_v39 = vunpack.c.h.s8.bf16 (!%p1781_p3), %v730_v25  ;;  %v739_v40 = vunpack.c.h.s8.bf16 (!%p1781_p3), %v732_v26 }
  0xf0   : > { %696 = vst [vmem:[#allocation2 + $0x60] sm:$0xff] %v1847_v21  ;;  %697 = vst [vmem:[#allocation2 + $0x68] sm:$0xff] %v1848_v22  ;;  %v736_v41 = vunpack.c.l.s8.bf16 (!%p1781_p3), %v731_v37  ;;  %v740_v42 = vunpack.c.l.s8.bf16 (!%p1781_p3), %v733_v38  ;;  %v737_v43 = vunpack.c.h.s8.bf16 (!%p1781_p3), %v731_v37  ;;  %v741_v44 = vunpack.c.h.s8.bf16 (!%p1781_p3), %v733_v38 }
  0xf1   : > { %698 = vst [vmem:[#allocation2 + $0x70] sm:$0xff] %v1851_v23  ;;  %699 = vst [vmem:[#allocation2 + $0x78] sm:$0xff] %v1852_v24  ;;  %1958 = vmatprep.mubr.bf16.mxu0 (!%p1781_p3), %v734_v27  ;;  %1966 = vmatprep.mubr.bf16.mxu1 (!%p1781_p3), %v738_v28  ;;  %v742_v47 = vld [vmem:[#allocation2] sm:$0xff] (!%p1781_p3)  ;;  %v743_v57 = vld [vmem:[#allocation2 + $0x8] sm:$0xff] (!%p1781_p3) }
  0xf2   : > { %v744_v45 = vld [vmem:[#allocation2 + $0x10] sm:$0xff] (!%p1781_p3)  ;;  %v745_v51 = vld [vmem:[#allocation2 + $0x18] sm:$0xff] (!%p1781_p3) }
  0xf3   : > { %v746_v7 = vld [vmem:[#allocation2 + $0x20] sm:$0xff] (!%p1781_p3)  ;;  %v747_v17 = vld [vmem:[#allocation2 + $0x28] sm:$0xff] (!%p1781_p3) }
  0xf4   : > { %s1782_s29 = sshll.u32 (!%p1781_p3), %s714_s1, 7  ;;  %v748_v5 = vld [vmem:[#allocation2 + $0x30] sm:$0xff] (!%p1781_p3)  ;;  %v749_v11 = vld [vmem:[#allocation2 + $0x38] sm:$0xff] (!%p1781_p3) }
  0xf5   : > { %s716_s4 = sshra.s32 (!%p1781_p3), %s1782_s29, 4  ;;  %v750_v48 = vld [vmem:[#allocation2 + $0x40] sm:$0xff] (!%p1781_p3)  ;;  %v751_v58 = vld [vmem:[#allocation2 + $0x48] sm:$0xff] (!%p1781_p3) }
  0xf6   : > { %s719_s10 = sadd.s32 %s1783_s28, %s716_s4  ;;  %v752_v46 = vld [vmem:[#allocation2 + $0x50] sm:$0xff]  ;;  %v753_v52 = vld [vmem:[#allocation2 + $0x58] sm:$0xff] }
  0xf7   : > { %s1784_s12 = sshll.u32 %s719_s10, 3  ;;  %v754_v8 = vld [vmem:[#allocation2 + $0x60] sm:$0xff]  ;;  %v755_v18 = vld [vmem:[#allocation2 + $0x68] sm:$0xff] }
  0xf8   : > { %s3072_s23 = scalar_lea.vmem [#allocation3], %s1784_s12  ;;  %v756_v6 = vld [vmem:[#allocation2 + $0x70] sm:$0xff]  ;;  %v757_v12 = vld [vmem:[#allocation2 + $0x78] sm:$0xff] }
  0xf9   : > { %v722_v29 = vld [vmem:[%s3072_s23] sm:$0xff]  ;;  %v723_v30 = vld [vmem:[%s3072_s23 + $0x8] sm:$0xff]  ;;  %v724_v31 = vld [vmem:[%s3072_s23 + $0x10] sm:$0xff] }
  0xfa   : > { %1942 = vmatprep.subr.bf16.mxu0 %v722_v29  ;;  %2156 = vmatprep.subr.bf16.mxu1 %v722_v29  ;;  %v725_v32 = vld [vmem:[%s3072_s23 + $0x18] sm:$0xff]  ;;  %v726_v33 = vld [vmem:[%s3072_s23 + $0x20] sm:$0xff]  ;;  %v727_v34 = vld [vmem:[%s3072_s23 + $0x28] sm:$0xff] }
  0xfb   : > { %1943 = vmatpush3.bf16.msra.mxu0 %v722_v29  ;;  %2164 = vmatpush3.bf16.msra.mxu1 %v722_v29  ;;  %v728_v35 = vld [vmem:[%s3072_s23 + $0x30] sm:$0xff]  ;;  %v729_v36 = vld [vmem:[%s3072_s23 + $0x38] sm:$0xff] }
  0xfc   : > { %1944 = vmatprep.subr.bf16.mxu0 %v723_v30  ;;  %2157 = vmatprep.subr.bf16.mxu1 %v723_v30 }
  0xff   : > { %1945 = vmatpush3.bf16.msra.mxu0 %v723_v30  ;;  %2165 = vmatpush3.bf16.msra.mxu1 %v723_v30 }
 0x100   : > { %1946 = vmatprep.subr.bf16.mxu0 %v724_v31  ;;  %2158 = vmatprep.subr.bf16.mxu1 %v724_v31 }
 0x103   : > { %1947 = vmatpush3.bf16.msra.mxu0 %v724_v31  ;;  %2166 = vmatpush3.bf16.msra.mxu1 %v724_v31 }
 0x104   : > { %1948 = vmatprep.subr.bf16.mxu0 %v725_v32  ;;  %2159 = vmatprep.subr.bf16.mxu1 %v725_v32 }
 0x107   : > { %1949 = vmatpush3.bf16.msra.mxu0 %v725_v32  ;;  %2167 = vmatpush3.bf16.msra.mxu1 %v725_v32 }
 0x108   : > { %1950 = vmatprep.subr.bf16.mxu0 %v726_v33  ;;  %2160 = vmatprep.subr.bf16.mxu1 %v726_v33 }
 0x10b   : > { %1951 = vmatpush3.bf16.msra.mxu0 %v726_v33  ;;  %2168 = vmatpush3.bf16.msra.mxu1 %v726_v33 }
 0x10c   : > { %1952 = vmatprep.subr.bf16.mxu0 %v727_v34  ;;  %2161 = vmatprep.subr.bf16.mxu1 %v727_v34 }
 0x10f   : > { %1953 = vmatpush3.bf16.msra.mxu0 %v727_v34  ;;  %2169 = vmatpush3.bf16.msra.mxu1 %v727_v34 }
 0x110   : > { %1954 = vmatprep.subr.bf16.mxu0 %v728_v35  ;;  %2162 = vmatprep.subr.bf16.mxu1 %v728_v35 }
 0x113   : > { %1955 = vmatpush3.bf16.msra.mxu0 %v728_v35  ;;  %2170 = vmatpush3.bf16.msra.mxu1 %v728_v35 }
 0x114   : > { %1956 = vmatprep.subr.bf16.mxu0 %v729_v36  ;;  %2163 = vmatprep.subr.bf16.mxu1 %v729_v36 }
 0x117   : > { %1957 = vmatpush3.bf16.msra.mxu0 %v729_v36  ;;  %2171 = vmatpush3.bf16.msra.mxu1 %v729_v36 }
 0x11a   : > { %1959 = vmatmul.mubr.bf16.vlgmr.msra.gmra.mrb[0].mxu0 %v735_v39  ;;  %1967 = vmatmul.mubr.bf16.vlgmr.msra.gmra.mrb[0].mxu1 %v739_v40 }
 0x11b   : > { %1962 = vmatprep.mubr.bf16.mxu0 %v736_v41  ;;  %1970 = vmatprep.mubr.bf16.mxu1 %v740_v42 }
 0x122   : > { %1963 = vmatmul.mubr.bf16.gmra.mrb[4].mxu0 %v737_v43  ;;  %1971 = vmatmul.mubr.bf16.gmra.mrb[4].mxu1 %v741_v44 }
 0x1ed   : > { %v1960_v49 = vpop.f32.mrb[0].mxu0  ;;  %v1968_v50 = vpop.f32.mrb[0].mxu1 }
 0x1ee   : > { %v857_v53 = vadd.f32 %v1960_v49, %v744_v45  ;;  %v865_v54 = vadd.f32 %v1968_v50, %v752_v46  ;;  %v792_v55 = vpop.f32.mrb[1].mxu0  ;;  %v824_v56 = vpop.f32.mrb[1].mxu1 }
 0x1ef   : > { %v855_v59 = vadd.f32 %v792_v55, %v742_v47  ;;  %v863_v60 = vadd.f32 %v824_v56, %v750_v48  ;;  %v1961_v61 = vpop.f32.mrb[2].mxu0  ;;  %v1969_v62 = vpop.f32.mrb[2].mxu1 }
 0x1f0   : > { %873 = vst [vmem:[#allocation2 + $0x10] sm:$0xff] %v857_v53  ;;  %881 = vst [vmem:[#allocation2 + $0x50] sm:$0xff] %v865_v54  ;;  %v858_v63 = vadd.f32 %v1961_v61, %v745_v51  ;;  %v866_v0 = vadd.f32 %v1969_v62, %v753_v52  ;;  %v795_v1 = vpop.f32.mrb[3].mxu0  ;;  %v827_v2 = vpop.f32.mrb[3].mxu1 }
 0x1f1   : > { %871 = vst [vmem:[#allocation2] sm:$0xff] %v855_v59  ;;  %879 = vst [vmem:[#allocation2 + $0x40] sm:$0xff] %v863_v60  ;;  %v856_v3 = vadd.f32 %v795_v1, %v743_v57  ;;  %v864_v4 = vadd.f32 %v827_v2, %v751_v58 }
 0x1f2   : > { %874 = vst [vmem:[#allocation2 + $0x18] sm:$0xff] %v858_v63  ;;  %882 = vst [vmem:[#allocation2 + $0x58] sm:$0xff] %v866_v0 }
 0x1f3   : > { %872 = vst [vmem:[#allocation2 + $0x8] sm:$0xff] %v856_v3  ;;  %880 = vst [vmem:[#allocation2 + $0x48] sm:$0xff] %v864_v4 }
 0x1f5   : > { %v1964_v9 = vpop.f32.mrb[4].mxu0  ;;  %v1972_v10 = vpop.f32.mrb[4].mxu1 }
 0x1f6   : > { %v861_v13 = vadd.f32 %v1964_v9, %v748_v5  ;;  %v869_v14 = vadd.f32 %v1972_v10, %v756_v6  ;;  %v808_v15 = vpop.f32.mrb[5].mxu0  ;;  %v840_v16 = vpop.f32.mrb[5].mxu1 }
 0x1f7   : > { %v859_v19 = vadd.f32 %v808_v15, %v746_v7  ;;  %v867_v20 = vadd.f32 %v840_v16, %v754_v8  ;;  %v1965_v21 = vpop.f32.mrb[6].mxu0  ;;  %v1973_v22 = vpop.f32.mrb[6].mxu1 }
 0x1f8   : > { %877 = vst [vmem:[#allocation2 + $0x30] sm:$0xff] %v861_v13  ;;  %885 = vst [vmem:[#allocation2 + $0x70] sm:$0xff] %v869_v14  ;;  %v862_v23 = vadd.f32 %v1965_v21, %v749_v11  ;;  %v870_v24 = vadd.f32 %v1973_v22, %v757_v12  ;;  %v811_v25 = vpop.f32.mrb[7].mxu0  ;;  %v843_v26 = vpop.f32.mrb[7].mxu1 }
 0x1f9   : > { %875 = vst [vmem:[#allocation2 + $0x20] sm:$0xff] %v859_v19  ;;  %883 = vst [vmem:[#allocation2 + $0x60] sm:$0xff] %v867_v20  ;;  %v860_v27 = vadd.f32 %v811_v25, %v747_v17  ;;  %v868_v28 = vadd.f32 %v843_v26, %v755_v18 }
 0x1fa   : > { %878 = vst [vmem:[#allocation2 + $0x38] sm:$0xff] %v862_v23  ;;  %886 = vst [vmem:[#allocation2 + $0x78] sm:$0xff] %v870_v24 }
 0x1fb   : > { %876 = vst [vmem:[#allocation2 + $0x28] sm:$0xff] %v860_v27  ;;  %884 = vst [vmem:[#allocation2 + $0x68] sm:$0xff] %v868_v28 }
 0x1fc PF: > { %v2311_v29 = vld [vmem:[%s3020_s6] sm:$0xff]   ;;  %v2312_v30 = vld [vmem:[%s3020_s6 + $0x8] sm:$0xff]   ;;  %v2313_v31 = vld [vmem:[%s3020_s6 + $0x10] sm:$0xff]   ;;  %p1274_p8 = scmp.eq.s32.totalorder %s2633_s16, 2  ;;  %s1319_s24 = sand.u32 1, %s2633_s16 }
 0x1fd   : > { %1974 = vmatprep.subr.bf16.mxu0 %v2311_v29  ;;  %v2314_v32 = vld [vmem:[%s3020_s6 + $0x18] sm:$0xff]   ;;  %v891_v34 = vld [vmem:[#allocation2 + $0x8] sm:$0xff]  ;;  %v2320_v38 = vld [vmem:[%s3022_s20 + $0x8] sm:$0xff]   ;;  %s1819_s8 = sshll.u32 %s1319_s24, 6  ;;  %p1805_p12 = scmp.ne.s32.totalorder %s2633_s16, 2 }
 0x1fe   : > { %1975 = vmatpush3.bf16.msra.mxu0 %v2311_v29  ;;  %v890_v33 = vld [vmem:[#allocation2] sm:$0xff]  ;;  %v2315_v36 = vld [vmem:[%s3020_s6 + $0x20] sm:$0xff]   ;;  %v2316_v39 = vld [vmem:[%s3020_s6 + $0x28] sm:$0xff]   ;;  %vm2656_vm1 = vmmov (!%p1805_p12), 0   ;;  %s3365_s0 = sld [smem:[#allocation41_spill]] (!%p1805_p12) }
 0x1ff   : > { %1976 = vmatprep.subr.bf16.mxu0 %v2312_v30  ;;  %v906_v35 = vpack.c.bf16 %v891_v34, %v890_v33  ;;  %v2319_v37 = vld [vmem:[%s3022_s20] sm:$0xff]   ;;  %v2321_v40 = vld [vmem:[%s3022_s20 + $0x10] sm:$0xff]   ;;  %v2322_v42 = vld [vmem:[%s3022_s20 + $0x18] sm:$0xff]  }
 0x200   : > { %2006 = vmatprep.subr.bf16.mxu1 %v2319_v37  ;;  %v2317_v41 = vld [vmem:[%s3020_s6 + $0x30] sm:$0xff]   ;;  %v2318_v43 = vld [vmem:[%s3020_s6 + $0x38] sm:$0xff]   ;;  %v2323_v44 = vld [vmem:[%s3022_s20 + $0x20] sm:$0xff]  }
 0x201   : > { %1990 = vmatprep.mubr.bf16.mxu0 %v906_v35  ;;  %2007 = vmatpush3.bf16.msra.mxu1 %v2319_v37  ;;  %v892_v45 = vld [vmem:[#allocation2 + $0x10] sm:$0xff]  ;;  %v893_v46 = vld [vmem:[#allocation2 + $0x18] sm:$0xff]  ;;  %v894_v47 = vld [vmem:[#allocation2 + $0x20] sm:$0xff] }
 0x202   : > { %1977 = vmatpush3.bf16.msra.mxu0 %v2312_v30  ;;  %2008 = vmatprep.subr.bf16.mxu1 %v2320_v38  ;;  %v895_v48 = vld [vmem:[#allocation2 + $0x28] sm:$0xff]  ;;  %v907_v49 = vpack.c.bf16 %v893_v46, %v892_v45  ;;  %v2324_v50 = vld [vmem:[%s3022_s20 + $0x28] sm:$0xff]   ;;  %v897_v53 = vld [vmem:[#allocation2 + $0x38] sm:$0xff] }
 0x203   : > { %1978 = vmatprep.subr.bf16.mxu0 %v2313_v31  ;;  %v908_v51 = vpack.c.bf16 %v895_v48, %v894_v47  ;;  %v896_v52 = vld [vmem:[#allocation2 + $0x30] sm:$0xff]  ;;  %v898_v54 = vld [vmem:[#allocation2 + $0x40] sm:$0xff]  ;;  %v899_v55 = vld [vmem:[#allocation2 + $0x48] sm:$0xff] }
 0x204   : > { %v909_v56 = vpack.c.bf16 %v897_v53, %v896_v52  ;;  %v910_v57 = vpack.c.bf16 %v899_v55, %v898_v54  ;;  %v900_v58 = vld [vmem:[#allocation2 + $0x50] sm:$0xff]  ;;  %v901_v59 = vld [vmem:[#allocation2 + $0x58] sm:$0xff]  ;;  %v902_v60 = vld [vmem:[#allocation2 + $0x60] sm:$0xff] }
 0x205   : > { %2009 = vmatpush3.bf16.msra.mxu1 %v2320_v38  ;;  %v903_v61 = vld [vmem:[#allocation2 + $0x68] sm:$0xff]  ;;  %v911_v62 = vpack.c.bf16 %v901_v59, %v900_v58  ;;  %v904_v0 = vld [vmem:[#allocation2 + $0x70] sm:$0xff]  ;;  %v905_v1 = vld [vmem:[#allocation2 + $0x78] sm:$0xff] }
 0x206   : > { %1979 = vmatpush3.bf16.msra.mxu0 %v2313_v31  ;;  %2010 = vmatprep.subr.bf16.mxu1 %v2321_v40  ;;  %v912_v63 = vpack.c.bf16 %v903_v61, %v902_v60  ;;  %v913_v2 = vpack.c.bf16 %v905_v1, %v904_v0  ;;  %v2325_v3 = vld [vmem:[%s3022_s20 + $0x30] sm:$0xff]   ;;  %v2326_v4 = vld [vmem:[%s3022_s20 + $0x38] sm:$0xff]   ;;  %s1291_s20 = scalar_select %p1274_p8, 1, 0 }
 0x207   : > { %1980 = vmatprep.subr.bf16.mxu0 %v2314_v32  ;;  %v1785_v5 = vld [vmem:[%s607_s21] ss:$0 sm:$0xff] }
 0x208   : > { %v1292_v1 = vstv %s1291_s20 }
 0x209   : > { %2011 = vmatpush3.bf16.msra.mxu1 %v2321_v40  ;;  %vm3117_vm0 = vcmp.eq.s32.totalorder %v1292_v1, 1 }
 0x20a   : > { %1981 = vmatpush3.bf16.msra.mxu0 %v2314_v32  ;;  %2012 = vmatprep.subr.bf16.mxu1 %v2322_v42 }
 0x20b   : > { %1982 = vmatprep.subr.bf16.mxu0 %v2315_v36 }
 0x20d   : > { %2013 = vmatpush3.bf16.msra.mxu1 %v2322_v42 }
 0x20e   : > { %1983 = vmatpush3.bf16.msra.mxu0 %v2315_v36  ;;  %2014 = vmatprep.subr.bf16.mxu1 %v2323_v44 }
 0x20f   : > { %1984 = vmatprep.subr.bf16.mxu0 %v2316_v39 }
 0x211   : > { %2015 = vmatpush3.bf16.msra.mxu1 %v2323_v44 }
 0x212   : > { %1985 = vmatpush3.bf16.msra.mxu0 %v2316_v39  ;;  %2016 = vmatprep.subr.bf16.mxu1 %v2324_v50 }
 0x213   : > { %1986 = vmatprep.subr.bf16.mxu0 %v2317_v41 }
 0x215   : > { %2017 = vmatpush3.bf16.msra.mxu1 %v2324_v50 }
 0x216   : > { %1987 = vmatpush3.bf16.msra.mxu0 %v2317_v41  ;;  %2018 = vmatprep.subr.bf16.mxu1 %v2325_v3 }
 0x217   : > { %1988 = vmatprep.subr.bf16.mxu0 %v2318_v43 }
 0x219   : > { %2019 = vmatpush3.bf16.msra.mxu1 %v2325_v3 }
 0x21a   : > { %1989 = vmatpush3.bf16.msra.mxu0 %v2318_v43  ;;  %2020 = vmatprep.subr.bf16.mxu1 %v2326_v4 }
 0x21d   : > { %1991 = vmatmul.mubr.bf16.vlgmr.msra.gmra.mrb[0].mxu0 %v907_v49  ;;  %2021 = vmatpush3.bf16.msra.mxu1 %v2326_v4 }
 0x21e   : > { %1994 = vmatprep.mubr.bf16.mxu0 %v908_v51 }
 0x225   : > { %1995 = vmatmul.mubr.bf16.gmra.mrb[4].mxu0 %v909_v56 }
 0x226   : > { %1998 = vmatprep.mubr.bf16.mxu0 %v910_v57 }
 0x22d   : > { %1999 = vmatmul.mubr.bf16.gmra.mrb[8].mxu0 %v911_v62  ;;  %v3111_v62 = vld [vmem:[%s610_s25] ss:$0 sm:$0xff]  ;;  %s3147_s25 = scalar_lea.vmem [#allocation3], %s1819_s8 }
 0x22e   : > { %2002 = vmatprep.mubr.bf16.mxu0 %v912_v63 }
 0x235   : > { %2003 = vmatmul.mubr.bf16.gmra.mrb[12].mxu0 %v913_v2 }
 0x2f0   : > { %v1992_v6 = vpop.f32.mrb[0].mxu0 }
 0x2f1   : > { %v1028_v7 = vadd.f32 %v1992_v6, %v1785_v5  ;;  %v1019_v8 = vpop.f32.mrb[1].mxu0 }
 0x2f2   : > { %v1020_v9 = vadd.f32 %v1785_v5, %v1019_v8  ;;  %v1993_v10 = vpop.f32.mrb[2].mxu0  ;;  %v2657_v8 = vmov (!%p1805_p12), 0.0  }
 0x2f3   : > { %v1031_v11 = vadd.f32 %v1993_v10, %v1785_v5  ;;  %v1022_v12 = vpop.f32.mrb[3].mxu0  ;;  %v1084_v14 = vmax.f32 %v1028_v7, 0.0  ;;  %2070 = vmatprep.mubr.msk.f32.mxu0 (!%p1805_p12), %vm2656_vm1, %v2657_v8 }
 0x2f4   : > { %v1023_v13 = vadd.f32 %v1785_v5, %v1022_v12  ;;  %v1082_v16 = vmax.f32 %v1020_v9, 0.0 }
 0x2f5   : > { %v1085_v15 = vmax.f32 %v1031_v11, 0.0 }
 0x2f6   : > { %v1083_v17 = vmax.f32 %v1023_v13, 0.0 }
 0x2f7   : > { %v1099_v18 = vpack.c.bf16 %v1085_v15, %v1084_v14 }
 0x2f8   : > { %v1996_v19 = vpop.f32.mrb[4].mxu0  ;;  %v1098_v20 = vpack.c.bf16 %v1083_v17, %v1082_v16 }
 0x2f9   : > { %v1044_v21 = vadd.f32 %v1996_v19, %v1785_v5  ;;  %v1035_v22 = vpop.f32.mrb[5].mxu0 }
 0x2fa   : > { %v1036_v23 = vadd.f32 %v1785_v5, %v1035_v22  ;;  %v1997_v24 = vpop.f32.mrb[6].mxu0  ;;  %2022 = vmatprep.mubr.bf16.mxu1 %v1098_v20 }
 0x2fb   : > { %v1047_v25 = vadd.f32 %v1997_v24, %v1785_v5  ;;  %v1038_v26 = vpop.f32.mrb[7].mxu0  ;;  %2023 = vmatmul.mubr.bf16.vlgmr.msra.gmra.mrb[0].mxu1 %v1099_v18  ;;  %v1088_v28 = vmax.f32 %v1044_v21, 0.0 }
 0x2fc   : > { %v1039_v27 = vadd.f32 %v1785_v5, %v1038_v26  ;;  %v1086_v30 = vmax.f32 %v1036_v23, 0.0 }
 0x2fd   : > { %v1089_v29 = vmax.f32 %v1047_v25, 0.0 }
 0x2fe   : > { %v1087_v31 = vmax.f32 %v1039_v27, 0.0 }
 0x2ff   : > { %v1101_v32 = vpack.c.bf16 %v1089_v29, %v1088_v28 }
 0x300   : > { %v1100_v33 = vpack.c.bf16 %v1087_v31, %v1086_v30  ;;  %v2000_v34 = vpop.f32.mrb[8].mxu0 }
 0x301   : > { %v1060_v35 = vadd.f32 %v2000_v34, %v1785_v5  ;;  %v1051_v36 = vpop.f32.mrb[9].mxu0 }
 0x302   : > { %v1052_v37 = vadd.f32 %v1785_v5, %v1051_v36  ;;  %v2001_v38 = vpop.f32.mrb[10].mxu0  ;;  %2026 = vmatprep.mubr.bf16.mxu1 %v1100_v33 }
 0x303   : > { %v1063_v39 = vadd.f32 %v2001_v38, %v1785_v5  ;;  %v1054_v40 = vpop.f32.mrb[11].mxu0  ;;  %2027 = vmatmul.mubr.bf16.gmra.mrb[4].mxu1 %v1101_v32  ;;  %v1092_v42 = vmax.f32 %v1060_v35, 0.0 }
 0x304   : > { %v1055_v41 = vadd.f32 %v1785_v5, %v1054_v40  ;;  %v1090_v44 = vmax.f32 %v1052_v37, 0.0 }
 0x305   : > { %v1093_v43 = vmax.f32 %v1063_v39, 0.0 }
 0x306   : > { %v1091_v45 = vmax.f32 %v1055_v41, 0.0 }
 0x307   : > { %v1103_v46 = vpack.c.bf16 %v1093_v43, %v1092_v42 }
 0x308   : > { %v1102_v47 = vpack.c.bf16 %v1091_v45, %v1090_v44  ;;  %v2004_v48 = vpop.f32.mrb[12].mxu0 }
 0x309   : > { %v1076_v49 = vadd.f32 %v2004_v48, %v1785_v5  ;;  %v1067_v50 = vpop.f32.mrb[13].mxu0 }
 0x30a   : > { %v1068_v51 = vadd.f32 %v1785_v5, %v1067_v50  ;;  %v2005_v52 = vpop.f32.mrb[14].mxu0  ;;  %2030 = vmatprep.mubr.bf16.mxu1 %v1102_v47 }
 0x30b   : > { %v1079_v53 = vadd.f32 %v2005_v52, %v1785_v5  ;;  %v1070_v54 = vpop.f32.mrb[15].mxu0  ;;  %2031 = vmatmul.mubr.bf16.gmra.mrb[8].mxu1 %v1103_v46  ;;  %v1096_v56 = vmax.f32 %v1076_v49, 0.0 }
 0x30c   : > { %v1071_v55 = vadd.f32 %v1785_v5, %v1070_v54  ;;  %v1094_v58 = vmax.f32 %v1068_v51, 0.0 }
 0x30d   : > { %v1097_v57 = vmax.f32 %v1079_v53, 0.0 }
 0x30e   : > { %v1095_v59 = vmax.f32 %v1071_v55, 0.0 }
 0x30f   : > { %v1105_v60 = vpack.c.bf16 %v1097_v57, %v1096_v56 }
 0x310   : > { %v1104_v61 = vpack.c.bf16 %v1095_v59, %v1094_v58 }
 0x312   : > { %2034 = vmatprep.mubr.bf16.mxu1 %v1104_v61 }
 0x313   : > { %2035 = vmatmul.mubr.bf16.gmra.mrb[12].mxu1 %v1105_v60 }
 0x3ce   : > { %v2024_v63 = vpop.f32.mrb[0].mxu1 }
 0x3cf   : > { %v1220_v0 = vadd.f32 %v2024_v63, %v3111_v62  ;;  %v1211_v2 = vpop.f32.mrb[1].mxu1 }
 0x3d0   : > { %v1212_v3 = vadd.f32 %v3111_v62, %v1211_v2  ;;  %v2025_v4 = vpop.f32.mrb[2].mxu1 }
 0x3d1   : > { %v1277_v5 = vmax.f32 %v1220_v0, 0.0  ;;  %v1223_v6 = vadd.f32 %v2025_v4, %v3111_v62  ;;  %v1214_v7 = vpop.f32.mrb[3].mxu1 }
 0x3d2   : > { %v1275_v9 = vmax.f32 %v1212_v3, 0.0  ;;  %v1215_v10 = vadd.f32 %v3111_v62, %v1214_v7 }
 0x3d3   : > { %v1278_v11 = vmax.f32 %v1223_v6, 0.0  ;;  %v3124_v13 = vsel %vm3117_vm0, %v1220_v0, %v1277_v5 }
 0x3d4   : > { %v1276_v12 = vmax.f32 %v1215_v10, 0.0  ;;  %v3132_v15 = vsel %vm3117_vm0, %v1212_v3, %v1275_v9  ;;  %1339 = vst [vmem:[#allocation17 + $0x10] sm:$0xff] (!%p1805_p12), %v3124_v13 }
 0x3d5   : > { %v3128_v14 = vsel %vm3117_vm0, %v1223_v6, %v1278_v11  ;;  %1337 = vst [vmem:[#allocation17] sm:$0xff] (!%p1805_p12), %v3132_v15  ;;  %v1354_v11 = vld [vmem:[%s3365_s0] sm:$0xff] (!%p1805_p12) }
 0x3d6   : > { %v3136_v16 = vpack.c.bf16 %v3128_v14, %v3124_v13  ;;  %v3140_v17 = vsel %vm3117_vm0, %v1215_v10, %v1276_v12  ;;  %v2028_v18 = vpop.f32.mrb[4].mxu1  ;;  %1340 = vst [vmem:[#allocation17 + $0x18] sm:$0xff] (!%p1805_p12), %v3128_v14  ;;  %v1353_v12 = vld [vmem:[#allocation4] sm:$0xff] (!%p1805_p12) }
 0x3d7   : > { %v3144_v19 = vpack.c.bf16 %v3140_v17, %v3132_v15  ;;  %v1236_v20 = vadd.f32 %v2028_v18, %v3111_v62  ;;  %v1227_v21 = vpop.f32.mrb[5].mxu1  ;;  %1338 = vst [vmem:[#allocation17 + $0x8] sm:$0xff] (!%p1805_p12), %v3140_v17 }
 0x3d8   : > { %1327 = vst [vmem:[%s3147_s25 + $0x8] sm:$0xff] %v3136_v16  ;;  %v1228_v22 = vadd.f32 %v3111_v62, %v1227_v21  ;;  %v2029_v23 = vpop.f32.mrb[6].mxu1 }
 0x3d9   : > { %1326 = vst [vmem:[%s3147_s25] sm:$0xff] %v3144_v19  ;;  %v1281_v24 = vmax.f32 %v1236_v20, 0.0  ;;  %v1239_v25 = vadd.f32 %v2029_v23, %v3111_v62  ;;  %v1230_v26 = vpop.f32.mrb[7].mxu1 }
 0x3da   : > { %v1279_v27 = vmax.f32 %v1228_v22, 0.0  ;;  %v1231_v28 = vadd.f32 %v3111_v62, %v1230_v26 }
 0x3db   : > { %v1282_v29 = vmax.f32 %v1239_v25, 0.0  ;;  %v1300_v31 = vsel %vm3117_vm0, %v1236_v20, %v1281_v24 }
 0x3dc   : > { %v1280_v30 = vmax.f32 %v1231_v28, 0.0  ;;  %v1298_v33 = vsel %vm3117_vm0, %v1228_v22, %v1279_v27  ;;  %1343 = vst [vmem:[#allocation17 + $0x30] sm:$0xff] (!%p1805_p12), %v1300_v31 }
 0x3dd   : > { %v1301_v32 = vsel %vm3117_vm0, %v1239_v25, %v1282_v29  ;;  %1341 = vst [vmem:[#allocation17 + $0x20] sm:$0xff] (!%p1805_p12), %v1298_v33 }
 0x3de   : > { %v3162_v34 = vpack.c.bf16 %v1301_v32, %v1300_v31  ;;  %v1299_v35 = vsel %vm3117_vm0, %v1231_v28, %v1280_v30  ;;  %v2032_v36 = vpop.f32.mrb[8].mxu1  ;;  %1344 = vst [vmem:[#allocation17 + $0x38] sm:$0xff] (!%p1805_p12), %v1301_v32 }
 0x3df   : > { %v3166_v37 = vpack.c.bf16 %v1299_v35, %v1298_v33  ;;  %v1252_v38 = vadd.f32 %v2032_v36, %v3111_v62  ;;  %v1243_v39 = vpop.f32.mrb[9].mxu1  ;;  %1342 = vst [vmem:[#allocation17 + $0x28] sm:$0xff] (!%p1805_p12), %v1299_v35 }
 0x3e0   : > { %1329 = vst [vmem:[%s3147_s25 + $0x18] sm:$0xff] %v3162_v34  ;;  %v1244_v40 = vadd.f32 %v3111_v62, %v1243_v39  ;;  %v2033_v41 = vpop.f32.mrb[10].mxu1 }
 0x3e1   : > { %1328 = vst [vmem:[%s3147_s25 + $0x10] sm:$0xff] %v3166_v37  ;;  %v1285_v42 = vmax.f32 %v1252_v38, 0.0  ;;  %v1255_v43 = vadd.f32 %v2033_v41, %v3111_v62  ;;  %v1246_v44 = vpop.f32.mrb[11].mxu1 }
 0x3e2   : > { %v1283_v45 = vmax.f32 %v1244_v40, 0.0  ;;  %v1247_v46 = vadd.f32 %v3111_v62, %v1246_v44 }
 0x3e3   : > { %v1286_v47 = vmax.f32 %v1255_v43, 0.0  ;;  %v1304_v49 = vsel %vm3117_vm0, %v1252_v38, %v1285_v42 }
 0x3e4   : > { %v1284_v48 = vmax.f32 %v1247_v46, 0.0  ;;  %v1302_v51 = vsel %vm3117_vm0, %v1244_v40, %v1283_v45  ;;  %1347 = vst [vmem:[#allocation17 + $0x50] sm:$0xff] (!%p1805_p12), %v1304_v49 }
 0x3e5   : > { %v1305_v50 = vsel %vm3117_vm0, %v1255_v43, %v1286_v47  ;;  %1345 = vst [vmem:[#allocation17 + $0x40] sm:$0xff] (!%p1805_p12), %v1302_v51 }
 0x3e6   : > { %v1316_v52 = vpack.c.bf16 %v1305_v50, %v1304_v49  ;;  %v1303_v53 = vsel %vm3117_vm0, %v1247_v46, %v1284_v48  ;;  %v2036_v54 = vpop.f32.mrb[12].mxu1  ;;  %1348 = vst [vmem:[#allocation17 + $0x58] sm:$0xff] (!%p1805_p12), %v1305_v50 }
 0x3e7   : > { %v1315_v55 = vpack.c.bf16 %v1303_v53, %v1302_v51  ;;  %v1268_v56 = vadd.f32 %v2036_v54, %v3111_v62  ;;  %v1259_v57 = vpop.f32.mrb[13].mxu1  ;;  %1346 = vst [vmem:[#allocation17 + $0x48] sm:$0xff] (!%p1805_p12), %v1303_v53 }
 0x3e8   : > { %1331 = vst [vmem:[%s3147_s25 + $0x28] sm:$0xff] %v1316_v52  ;;  %v1260_v58 = vadd.f32 %v3111_v62, %v1259_v57  ;;  %v2037_v59 = vpop.f32.mrb[14].mxu1 }
 0x3e9   : > { %1330 = vst [vmem:[%s3147_s25 + $0x20] sm:$0xff] %v1315_v55  ;;  %v1289_v60 = vmax.f32 %v1268_v56, 0.0  ;;  %v1271_v61 = vadd.f32 %v2037_v59, %v3111_v62  ;;  %v1262_v63 = vpop.f32.mrb[15].mxu1 }
 0x3ea   : > { %v1287_v0 = vmax.f32 %v1260_v58, 0.0  ;;  %v1263_v1 = vadd.f32 %v3111_v62, %v1262_v63  ;;  %v2655_v62 = vmov (!%p1805_p12), 0.0|0.0  }
 0x3eb   : > { %v1290_v2 = vmax.f32 %v1271_v61, 0.0  ;;  %v1308_v4 = vsel %vm3117_vm0, %v1268_v56, %v1289_v60  ;;  %1336 = sbr.rel (%p1805_p12) target bundleno = 1250 (0x4e2), region = 101  ;;  %2108 = vmatprep.subr.bf16.mxu0 (!%p1805_p12), %v2655_v62 }
 0x3ec   : > { %v1288_v3 = vmax.f32 %v1263_v1, 0.0  ;;  %v1306_v6 = vsel %vm3117_vm0, %v1260_v58, %v1287_v0  ;;  %1351 = vst [vmem:[#allocation17 + $0x70] sm:$0xff] (!%p1805_p12), %v1308_v4  ;;  %2110 = vmatpush3.bf16.msra.mxu0 (!%p1805_p12), %v3144_v19 }
 0x3ed   : > { %v1309_v5 = vsel %vm3117_vm0, %v1271_v61, %v1290_v2  ;;  %1349 = vst [vmem:[#allocation17 + $0x60] sm:$0xff] (!%p1805_p12), %v1306_v6  ;;  %2111 = vmatprep.subr.bf16.mxu0 (!%p1805_p12), %v2655_v62 }
 0x3ee   : > { %v1318_v7 = vpack.c.bf16 %v1309_v5, %v1308_v4  ;;  %v1307_v9 = vsel %vm3117_vm0, %v1263_v1, %v1288_v3  ;;  %1352 = vst [vmem:[#allocation17 + $0x78] sm:$0xff] (!%p1805_p12), %v1309_v5 }
 0x3ef   : > { %v1317_v10 = vpack.c.bf16 %v1307_v9, %v1306_v6  ;;  %1350 = vst [vmem:[#allocation17 + $0x68] sm:$0xff] (!%p1805_p12), %v1307_v9 }
 0x3f0   : > { %1333 = vst [vmem:[%s3147_s25 + $0x38] sm:$0xff] %v1318_v7  ;;  %2113 = vmatpush3.bf16.msra.mxu0 (!%p1805_p12), %v3136_v16 }
 0x3f1   : > { %1332 = vst [vmem:[%s3147_s25 + $0x30] sm:$0xff] %v1317_v10  ;;  %2114 = vmatprep.subr.bf16.mxu0 (!%p1805_p12), %v2655_v62 }
 0x3f4   : > { %2116 = vmatpush3.bf16.msra.mxu0 %v3166_v37 }
 0x3f5   : > { %2117 = vmatprep.subr.bf16.mxu0 %v2655_v62 }
 0x3f8   : > { %2119 = vmatpush3.bf16.msra.mxu0 %v3162_v34 }
 0x3f9   : > { %2120 = vmatprep.subr.bf16.mxu0 %v2655_v62 }
 0x3fc   : > { %2122 = vmatpush3.bf16.msra.mxu0 %v1315_v55 }
 0x3fd   : > { %2123 = vmatprep.subr.bf16.mxu0 %v2655_v62 }
 0x400   : > { %2125 = vmatpush3.bf16.msra.mxu0 %v1316_v52 }
 0x401   : > { %2126 = vmatprep.subr.bf16.mxu0 %v2655_v62 }
 0x404   : > { %2128 = vmatpush3.bf16.msra.mxu0 %v1317_v10 }
 0x405   : > { %2129 = vmatprep.subr.bf16.mxu0 %v2655_v62 }
 0x408   : > { %2131 = vmatpush3.bf16.msra.mxu0 %v1318_v7 }
 0x40b   : > { %2071 = vmatmul.mubr.f32.vlgmr.msra.gmra.mrb[0].mxu0 %v1354_v11 }
 0x4de   : > { %v1421_v13 = vpop.f32.mrb[0].mxu0 }
 0x4df   : > { %v1425_v14 = vadd.f32 %v1421_v13, %v1353_v12  ;;  %v2072_v15 = vpop.f32.mrb[1].mxu0 }
 0x4e1   : > { %1426 = vst [vmem:[#allocation4] sm:$0xff] %v1425_v14 }
 0x4e2 PF: > { %1430 = sbr.rel (!%p1274_p8) target bundleno = 1499 (0x5db), region = 105  ;;  %v1432_v16 = vld [vmem:[#allocation16] sm:$0xff] (%p1274_p8)  ;;  %v1433_v17 = vld [vmem:[#allocation16 + $0x8] sm:$0xff] (%p1274_p8)  ;;  %v1434_v18 = vld [vmem:[#allocation16 + $0x10] sm:$0xff] (%p1274_p8)  ;;  %v2658_v19 = vmov (%p1274_p8), 0.0|0.0   ;;  %vm2659_vm2 = vmmov (%p1274_p8), 0  }
 0x4e3   : > { %2132 = vmatprep.subr.bf16.mxu0 (%p1274_p8), %v2658_v19  ;;  %v2133_v20 = vpack.c.bf16 (%p1274_p8), %v1433_v17, %v1432_v16  ;;  %v1435_v21 = vld [vmem:[#allocation16 + $0x18] sm:$0xff] (%p1274_p8)  ;;  %v2660_v22 = vmov (%p1274_p8), 0.0   ;;  %v1436_v24 = vld [vmem:[#allocation16 + $0x20] sm:$0xff] (%p1274_p8)  ;;  %v1437_v25 = vld [vmem:[#allocation16 + $0x28] sm:$0xff] (%p1274_p8)  ;;  %s3366_s11 = sld [smem:[#allocation43_spill]] (%p1274_p8) }
 0x4e4   : > { %2105 = vmatprep.mubr.msk.f32.mxu0 (%p1274_p8), %vm2659_vm2, %v2660_v22  ;;  %v2136_v23 = vpack.c.bf16 (%p1274_p8), %v1435_v21, %v1434_v18  ;;  %v2139_v26 = vpack.c.bf16 (%p1274_p8), %v1437_v25, %v1436_v24  ;;  %v1438_v27 = vld [vmem:[#allocation16 + $0x30] sm:$0xff] (%p1274_p8)  ;;  %v1439_v28 = vld [vmem:[#allocation16 + $0x38] sm:$0xff] (%p1274_p8)  ;;  %v1440_v30 = vld [vmem:[#allocation16 + $0x40] sm:$0xff] (%p1274_p8) }
 0x4e5   : > { %2134 = vmatpush3.bf16.msra.mxu0 (%p1274_p8), %v2133_v20  ;;  %v2142_v29 = vpack.c.bf16 (%p1274_p8), %v1439_v28, %v1438_v27  ;;  %v1441_v31 = vld [vmem:[#allocation16 + $0x48] sm:$0xff] (%p1274_p8)  ;;  %v1442_v33 = vld [vmem:[#allocation16 + $0x50] sm:$0xff] (%p1274_p8)  ;;  %v1443_v34 = vld [vmem:[#allocation16 + $0x58] sm:$0xff] (%p1274_p8) }
 0x4e6   : > { %2135 = vmatprep.subr.bf16.mxu0 (%p1274_p8), %v2658_v19  ;;  %v2145_v32 = vpack.c.bf16 (%p1274_p8), %v1441_v31, %v1440_v30  ;;  %v2148_v35 = vpack.c.bf16 (%p1274_p8), %v1443_v34, %v1442_v33  ;;  %v1444_v36 = vld [vmem:[#allocation16 + $0x60] sm:$0xff] (%p1274_p8)  ;;  %v1445_v37 = vld [vmem:[#allocation16 + $0x68] sm:$0xff] (%p1274_p8)  ;;  %v1446_v39 = vld [vmem:[#allocation16 + $0x70] sm:$0xff] (%p1274_p8) }
 0x4e7   : > { %v2151_v38 = vpack.c.bf16 (%p1274_p8), %v1445_v37, %v1444_v36  ;;  %v1447_v40 = vld [vmem:[#allocation16 + $0x78] sm:$0xff] (%p1274_p8) }
 0x4e8   : > { %v2154_v41 = vpack.c.bf16 (%p1274_p8), %v1447_v40, %v1446_v39  ;;  %v1431_v42 = vld [vmem:[#allocation4] sm:$0xff] (%p1274_p8) }
 0x4e9   : > { %2137 = vmatpush3.bf16.msra.mxu0 %v2136_v23  ;;  %v1807_v43 = vld [vmem:[%s3366_s11] ss:$0 sm:$0xff] }
 0x4ea   : > { %2138 = vmatprep.subr.bf16.mxu0 %v2658_v19 }
 0x4ed   : > { %2140 = vmatpush3.bf16.msra.mxu0 %v2139_v26 }
 0x4ee   : > { %2141 = vmatprep.subr.bf16.mxu0 %v2658_v19 }
 0x4f1   : > { %2143 = vmatpush3.bf16.msra.mxu0 %v2142_v29 }
 0x4f2   : > { %2144 = vmatprep.subr.bf16.mxu0 %v2658_v19 }
 0x4f5   : > { %2146 = vmatpush3.bf16.msra.mxu0 %v2145_v32 }
 0x4f6   : > { %2147 = vmatprep.subr.bf16.mxu0 %v2658_v19 }
 0x4f9   : > { %2149 = vmatpush3.bf16.msra.mxu0 %v2148_v35 }
 0x4fa   : > { %2150 = vmatprep.subr.bf16.mxu0 %v2658_v19 }
 0x4fd   : > { %2152 = vmatpush3.bf16.msra.mxu0 %v2151_v38 }
 0x4fe   : > { %2153 = vmatprep.subr.bf16.mxu0 %v2658_v19 }
 0x501   : > { %2155 = vmatpush3.bf16.msra.mxu0 %v2154_v41 }
 0x504   : > { %2106 = vmatmul.mubr.f32.vlgmr.msra.gmra.mrb[0].mxu0 %v1431_v42 }
 0x5d7   : > { %v1521_v44 = vpop.f32.mrb[0].mxu0 }
 0x5d8   : > { %v1522_v45 = vadd.f32 %v1807_v43, %v1521_v44  ;;  %v2107_v46 = vpop.f32.mrb[1].mxu0 }
 0x5da   : > { %1525 = vst [vmem:[#allocation18] sm:$0xff] %v1522_v45 }
 0x5db PF: > { %p2216_p4 = scmp.eq.s32.totalorder %s2778_s18, 2  ;;  %s2661_s26 = smov [#allocation17]  }
 0x5dc   : > { %s1542_s1 = sshll.u32 %s2661_s26, 4  ;;  %s1543_s1 = int_to_ptr.vmem [resolvable:$true] %s1542_s1 }
 0x5dd   : > { %s2497_s28 = scalar_lea.vmem %s1543_s1, 2048  ;;  %s2503_s29 = scalar_lea.vmem %s1543_s1, 4096 }
 0x5de   : > { %p2498_p7 = scmp.ne.s32.totalorder %s1543_s1, %s2497_s28  ;;  %p2504_p11 = scmp.lt.s32.totalorder %s1543_s1, %s1543_s1 }
 0x5df   : > { %p2505_p10 = scmp.lt.s32.totalorder %s2503_s29, %s2497_s28 }
 0x5e0   : > { %p2499_p9 = pnand %p2498_p7, %p2216_p4 }
 0x5e1   : > { %p2506_p13 = por %p2505_p10, %p2504_p11 }
 0x5e2   : > { %p2500_p1 = pneg %p2499_p9 }
 0x5e4   : > { %p2507_p0 = pnand %p2506_p13, %p2500_p1 }
 0x5e6   : > { %2510 = shalt.err (!%p2507_p0)
}
 0x5e7   : > { %s3367_s12 = sld [smem:[#allocation44_spill]] }
 0x5ed   : > { %s2511_s23 = scalar_lea.hbm %s3367_s12, 2048 }
 0x5ee   : > { %p2512_p5 = scmp.ne.s32.totalorder %s3367_s12, %s2511_s23  ;;  %p2517_p3 = scmp.lt.u32.totalorder %s2511_s23, %s3367_s12 }
 0x5f0   : > { %p2513_p2 = pnand %p2512_p5, %p2216_p4 }
 0x5f2   : > { %p2514_p6 = pneg %p2513_p2 }
 0x5f4   : > { %p2519_p8 = pnand %p2517_p3, %p2514_p6 }
 0x5f6   : > { %2522 = shalt.err (!%p2519_p8)
}
 0x5f7   : > { %s2662_s21 = smov 128   ;;  %s2663_s2 = smov 8  }
 0x5f8   : > { %2185 = dma.vmem_to_hbm [thread:$0]  (%p2216_p4), %s1543_s1, 2048, %s3367_s12, [#allocation10], %s2662_s21, %s2662_s21, %s2663_s2  }
 0x5f9   : > { %s2664_s8 = smov [#allocation18]  }
 0x5fa   : > { %s1556_s25 = sshll.u32 %s2664_s8, 4  ;;  %s1557_s25 = int_to_ptr.vmem [resolvable:$true] %s1556_s25 }
 0x5fb   : > { %s2523_s13 = scalar_lea.vmem %s1557_s25, 128  ;;  %p2530_p1 = scmp.lt.s32.totalorder %s1557_s25, %s1557_s25 }
 0x5fc   : > { %p2524_p12 = scmp.ne.s32.totalorder %s1557_s25, %s2523_s13  ;;  %p2531_p11 = scmp.lt.s32.totalorder %s2523_s13, %s2523_s13 }
 0x5fe   : > { %p2525_p7 = pnand %p2524_p12, %p2216_p4  ;;  %p2532_p10 = por %p2531_p11, %p2530_p1 }
 0x600   : > { %p2526_p9 = pneg %p2525_p7 }
 0x602   : > { %p2533_p13 = pnand %p2532_p10, %p2526_p9 }
 0x604   : > { %2536 = shalt.err (!%p2533_p13)
}
 0x605   : > { %s3368_s16 = sld [smem:[#allocation45_spill]] }
 0x60b   : > { %s3369_s11 = smov %s3368_s16  ;;  %s2537_s15 = scalar_lea.hbm %s3368_s16, 128 }
 0x60c   : > { %p2538_p0 = scmp.ne.s32.totalorder %s3369_s11, %s2537_s15  ;;  %p2543_p6 = scmp.lt.u32.totalorder %s2537_s15, %s3369_s11 }
 0x60e   : > { %p2539_p5 = pnand %p2538_p0, %p2216_p4 }
 0x610   : > { %p2540_p2 = pneg %p2539_p5 }
 0x612   : > { %p2545_p3 = pnand %p2543_p6, %p2540_p2 }
 0x614   : > { %2548 = shalt.err (!%p2545_p3)
}
 0x615   : > { %2187 = dma.vmem_to_hbm [thread:$0]  (%p2216_p4), %s1557_s25, 128, %s3369_s11, [#allocation19]  }
 0x616   : > { %2604 = dma.done.wait (%p2216_p4), [#allocation19], 128  }
 0x617   : > { %2606 = vsyncadd (%p2216_p4), [#allocation19], 4294967168 }
 0x618 PF: > { %p2219_p8 = scmp.ge.s32.totalorder %s2641_s17, 2  ;;  %s3370_s23 = sadd.s32 4294967294, %s2641_s17  }
 0x619   : > { %p2220_p12 = scmp.eq.s32.totalorder %s3370_s23, 2 }
 0x61b   : > { %p2210_p7 = pnand %p2220_p12, %p2219_p8 }
 0x61d   : > { %2608 = dma.done.wait (!%p2210_p7), [#allocation10], 2048  }
 0x61e   : > { %2610 = vsyncadd (!%p2210_p7), [#allocation10], 4294965248  ;;  %s37_s17 = sadd.s32 1, %s2641_s17   ;;  %s3371_s6 = sld [smem:[#allocation32_spill]] }
 0x61f   : > { %p34_p9 = scmp.ge.s32.totalorder %s37_s17, 5   ;;  %s3372_s14 = sld [smem:[#allocation36_spill]] }
 0x620   : > { %s3373_s15 = sld [smem:[#allocation33_spill]]  ;;  %s3374_s16 = sld [smem:[#allocation34_spill]] }
 0x621   : > { %s3375_s1 = sld [smem:[#allocation35_spill]]  ;;  %s3376_s29 = smov %s2617_s30 }
 0x622   : > { %s3274_s0 = smov 0   ;;  %36 = sbr.rel (!%p34_p9) target bundleno = 23 (0x17), region = 184 }
 0x624   : > { %s3377_s30 = smov %s3371_s6 }
 0x629   :  { %1578 = vsyncpa [#allocation9], 1 }
 0x62a   :  { %1580 = vsyncpa [#allocation9 + $0x1], 1 }
 0x62b   :  { %1581 = vsyncpa [#allocation12], 1 }
 0x62c   :  { %1583 = vsyncpa [#allocation12 + $0x1], 1 }
 0x62d   :  { %1584 = vsyncpa [#allocation15], 1 }
 0x62e   :  { %1586 = vsyncpa [#allocation15 + $0x1], 1 }
 0x62f   :  { %1587 = vsyncpa [#allocation10], 1 }
 0x630   :  { %1589 = vsyncpa [#allocation10 + $0x1], 1 }
 0x631   :  { %1590 = vsyncpa [#allocation19], 1 }

</bundles_post_ra>
